<compile_context>
chip_gen: v6e
topology: v6e:2x2x1
jax: 0.10.0
libtpu: 0.0.40
codegen_flags: <defaults>
</compile_context>

<pallas_src>
import jax
import jax.numpy as jnp
from jax.experimental import pallas as pl
from jax.experimental.pallas import tpu as pltpu


# ----------------------------------------------------------------------------
# Fused kernel: per image  y = W2 @ relu(W1 @ x + b1) + b2   in (C, H*W) layout
# ----------------------------------------------------------------------------
def _ffn_kernel(x_ref, w1_ref, b1_ref, w2_ref, b2_ref, o_ref):
    # x_ref : (nb, Cin, P)  bf16 activations, native NCHW layout (P = H*W on lanes)
    # w1_ref: (Cmid, Cin)   bf16      b1_ref: (Cmid, 1) f32
    # w2_ref: (Cout, Cmid)  bf16      b2_ref: (Cout, 1) f32
    # o_ref : (nb, Cout, P) f32
    w1 = w1_ref[...]
    b1 = b1_ref[...]
    w2 = w2_ref[...]
    b2 = b2_ref[...]
    nb = x_ref.shape[0]
    for n in range(nb):                       # small static unroll over images
        x_n = x_ref[n]                        # (Cin, P) bf16
        h = jnp.dot(w1, x_n, preferred_element_type=jnp.float32)
        h = jnp.maximum(h + b1, 0.0)          # bias broadcast along lanes
        y = jnp.dot(w2, h.astype(jnp.bfloat16),
                    preferred_element_type=jnp.float32)
        o_ref[n] = (y + b2).astype(o_ref.dtype)


def _pick_block_n(n_images, target_grid=4):
    """Largest divisor of n_images that yields >= target_grid grid steps.

    No padding ever (block must divide N); keeps >= 2 parallel steps when
    N >= 2 so v7x's two TensorCores both get work.
    """
    for nb in range(max(1, n_images // target_grid), 0, -1):
        if n_images % nb == 0:
            return nb
    return 1


def ffn_images_pallas(x, w1, b1, w2, b2, *, block_n=None):
    """Fused W2@relu(W1@x+b1)+b2 over x of shape (N, Cin, P) in NCHW-native layout."""
    N, Cin, P = x.shape
    Cmid, Cin_w = w1.shape
    Cout, Cmid_w = w2.shape
    assert Cin_w == Cin and Cmid_w == Cmid, (w1.shape, w2.shape, x.shape)

    if block_n is None:
        block_n = _pick_block_n(N)
    assert N % block_n == 0, (N, block_n)

    return pl.pallas_call(
        _ffn_kernel,
        out_shape=jax.ShapeDtypeStruct((N, Cout, P), jnp.float32),
        grid=(N // block_n,),
        in_specs=[
            pl.BlockSpec((block_n, Cin, P), lambda i: (i, 0, 0)),
            pl.BlockSpec((Cmid, Cin), lambda i: (0, 0)),    # weights stay VMEM-resident
            pl.BlockSpec((Cmid, 1), lambda i: (0, 0)),
            pl.BlockSpec((Cout, Cmid), lambda i: (0, 0)),
            pl.BlockSpec((Cout, 1), lambda i: (0, 0)),
        ],
        out_specs=pl.BlockSpec((block_n, Cout, P), lambda i: (i, 0, 0)),
        compiler_params=pltpu.CompilerParams(
            dimension_semantics=("parallel",)),
    )(x, w1, b1, w2, b2)


# ----------------------------------------------------------------------------
# One-time parameter prep (outside the hot path): bf16 weights, (C,1) f32 biases
# ----------------------------------------------------------------------------
def prepare_ffn_params(w1, b1, w2, b2):
    """w1/w2 are PyTorch Conv2d weights squeezed to (Cout, Cin): conv.weight[:, :, 0, 0]."""
    w1 = jnp.asarray(w1)
    w2 = jnp.asarray(w2)
    assert w2.shape[1] == w1.shape[0], "conv2 in_channels must equal conv1 out_channels"
    assert w2.shape[0] == w1.shape[1], "FFN final reshape requires out_channels == in_channels"
    return {
        "w1": w1.astype(jnp.bfloat16),
        "b1": jnp.asarray(b1, jnp.float32).reshape(-1, 1),
        "w2": w2.astype(jnp.bfloat16),
        "b2": jnp.asarray(b2, jnp.float32).reshape(-1, 1),
    }


# ----------------------------------------------------------------------------
# Module wrapper: matches FFN.forward (layout plumbing is reshape-only, free)
# ----------------------------------------------------------------------------
@jax.jit
def ffn_forward(x, params):
    B, L, C, H, W = x.shape
    assert params["w1"].shape[1] == C, "in_channels mismatch"
    xr = x.reshape(B * L, C, H * W)          # contiguous flatten: no transpose, no copy
    if xr.dtype != jnp.bfloat16:
        xr = xr.astype(jnp.bfloat16)         # ideally the caller already supplies bf16
    y = ffn_images_pallas(xr, params["w1"], params["b1"],
                          params["w2"], params["b2"])
    return y.reshape(B, L, C, H, W)          # Cout == Cin guaranteed by prepare_ffn_params


def ffn_reference(x, w1, b1, w2, b2):
    """Pure-JAX f32 reference of FFN.forward (1x1 convs as channel einsums)."""
    B, L, C, H, W = x.shape
    xr = x.astype(jnp.float32).reshape(B * L, C, H, W)
    h = jnp.einsum("dc,nchw->ndhw", w1, xr) + b1[None, :, None, None]
    h = jnp.maximum(h, 0.0)
    y = jnp.einsum("ed,ndhw->nehw", w2, h) + b2[None, :, None, None]
    return y.reshape(B, L, C, H, W)


if __name__ == "__main__":
    key = jax.random.PRNGKey(0)
    kx, kw1, kb1, kw2, kb2 = jax.random.split(key, 5)

    # in_channels == out_channels is required by the reshape in FFN.forward.
    # 16 images of (C=128, H*W=256): kernel grid = 4 parallel steps, no padding.
    B, L, C, H, W = 2, 8, 128, 16, 16
    x = jax.random.normal(kx, (B, L, C, H, W), jnp.float32).astype(jnp.bfloat16)

    # PyTorch Conv2d layout (Cout, Cin) == conv.weight[:, :, 0, 0]
    w1 = 0.05 * jax.random.normal(kw1, (C, C), jnp.float32)
    b1 = 0.01 * jax.random.normal(kb1, (C,), jnp.float32)
    w2 = 0.05 * jax.random.normal(kw2, (C, C), jnp.float32)
    b2 = 0.01 * jax.random.normal(kb2, (C,), jnp.float32)
    params = prepare_ffn_params(w1, b1, w2, b2)

    out = jax.block_until_ready(ffn_forward(x, params))
    ref = ffn_reference(x, w1, b1, w2, b2)

    assert out.shape == (B, L, C, H, W), out.shape
    assert out.dtype == jnp.float32
    assert bool(jnp.all(jnp.isfinite(out)))
    # bf16 activations/weights with f32 accumulation vs f32 reference
    assert bool(jnp.allclose(out, ref, rtol=3e-2, atol=2e-2)), float(
        jnp.max(jnp.abs(out - ref)))
    print("KERNEL_OK")
</pallas_src>

<mosaic_0001>
module attributes {stable_mosaic.version = 11 : i64} {
  func.func @_ffn_kernel(%arg0: i32, %arg1: memref<4x128x256xbf16, #tpu.memory_space<vmem>>, %arg2: memref<128x128xbf16, #tpu.memory_space<vmem>>, %arg3: memref<128x1xf32, #tpu.memory_space<vmem>>, %arg4: memref<128x128xbf16, #tpu.memory_space<vmem>>, %arg5: memref<128x1xf32, #tpu.memory_space<vmem>>, %arg6: memref<4x128x256xf32, #tpu.memory_space<vmem>>) attributes {dimension_semantics = [#tpu.dimension_semantics<parallel>], iteration_bounds = array<i64: 4>, scalar_prefetch = 0 : i64, scratch_operands = 0 : i64, tpu.core_type = #tpu.core_type<tc>, window_params = [{transform_indices = @transform_0, window_bounds = array<i64: 4, 128, 256>}, {pipeline_mode = #tpu.pipeline_mode<synchronous>, transform_indices = @transform_1, window_bounds = array<i64: 128, 128>}, {pipeline_mode = #tpu.pipeline_mode<synchronous>, transform_indices = @transform_2, window_bounds = array<i64: 128, 1>}, {pipeline_mode = #tpu.pipeline_mode<synchronous>, transform_indices = @transform_3, window_bounds = array<i64: 128, 128>}, {pipeline_mode = #tpu.pipeline_mode<synchronous>, transform_indices = @transform_4, window_bounds = array<i64: 128, 1>}, {transform_indices = @transform_5, window_bounds = array<i64: 4, 128, 256>}]} {
    %c0 = arith.constant 0 : index
    %c0_0 = arith.constant 0 : index
    %0 = vector.load %arg2[%c0, %c0_0] : memref<128x128xbf16, #tpu.memory_space<vmem>>, vector<128x128xbf16>
    %c0_1 = arith.constant 0 : index
    %c0_2 = arith.constant 0 : index
    %1 = vector.load %arg3[%c0_1, %c0_2] : memref<128x1xf32, #tpu.memory_space<vmem>>, vector<128x1xf32>
    %c0_3 = arith.constant 0 : index
    %c0_4 = arith.constant 0 : index
    %2 = vector.load %arg4[%c0_3, %c0_4] : memref<128x128xbf16, #tpu.memory_space<vmem>>, vector<128x128xbf16>
    %c0_5 = arith.constant 0 : index
    %c0_6 = arith.constant 0 : index
    %3 = vector.load %arg5[%c0_5, %c0_6] : memref<128x1xf32, #tpu.memory_space<vmem>>, vector<128x1xf32>
    %c0_7 = arith.constant 0 : index
    %c0_8 = arith.constant 0 : index
    %c0_9 = arith.constant 0 : index
    %4 = vector.load %arg1[%c0_7, %c0_8, %c0_9] : memref<4x128x256xbf16, #tpu.memory_space<vmem>>, vector<1x128x256xbf16>
    %5 = vector.shape_cast %4 : vector<1x128x256xbf16> to vector<128x256xbf16>
    %cst = arith.constant dense<0.000000e+00> : vector<128x256xf32>
    %6 = tpu.matmul %0, %5, %cst {dimension_numbers = #tpu.dot_dimension_numbers<[1], [0], [0], [1], [0, 0, 1, 1], [], []>} : vector<128x128xbf16>, vector<128x256xbf16>, vector<128x256xf32> -> vector<128x256xf32>
    %7 = vector.broadcast %1 : vector<128x1xf32> to vector<128x256xf32>
    %8 = arith.addf %6, %7 : vector<128x256xf32>
    %cst_10 = arith.constant 0.000000e+00 : f32
    %9 = vector.broadcast %cst_10 : f32 to vector<128x256xf32>
    %10 = arith.maximumf %8, %9 : vector<128x256xf32>
    %11 = arith.truncf %10 : vector<128x256xf32> to vector<128x256xbf16>
    %cst_11 = arith.constant dense<0.000000e+00> : vector<128x256xf32>
    %12 = tpu.matmul %2, %11, %cst_11 {dimension_numbers = #tpu.dot_dimension_numbers<[1], [0], [0], [1], [0, 0, 1, 1], [], []>} : vector<128x128xbf16>, vector<128x256xbf16>, vector<128x256xf32> -> vector<128x256xf32>
    %13 = vector.broadcast %3 : vector<128x1xf32> to vector<128x256xf32>
    %14 = arith.addf %12, %13 : vector<128x256xf32>
    %c0_12 = arith.constant 0 : index
    %c0_13 = arith.constant 0 : index
    %c0_14 = arith.constant 0 : index
    %15 = vector.load %arg6[%c0_12, %c0_13, %c0_14] : memref<4x128x256xf32, #tpu.memory_space<vmem>>, vector<1x128x256xf32>
    %16 = vector.shape_cast %15 : vector<1x128x256xf32> to vector<128x256xf32>
    %17 = vector.shape_cast %14 : vector<128x256xf32> to vector<1x128x256xf32>
    tpu.vector_store %arg6[%c0_12, %c0_13, %c0_14], %17 {strides = array<i32>} : memref<4x128x256xf32, #tpu.memory_space<vmem>>, vector<1x128x256xf32>,
    %c1 = arith.constant 1 : index
    %c0_15 = arith.constant 0 : index
    %c0_16 = arith.constant 0 : index
    %18 = vector.load %arg1[%c1, %c0_15, %c0_16] : memref<4x128x256xbf16, #tpu.memory_space<vmem>>, vector<1x128x256xbf16>
    %19 = vector.shape_cast %18 : vector<1x128x256xbf16> to vector<128x256xbf16>
    %cst_17 = arith.constant dense<0.000000e+00> : vector<128x256xf32>
    %20 = tpu.matmul %0, %19, %cst_17 {dimension_numbers = #tpu.dot_dimension_numbers<[1], [0], [0], [1], [0, 0, 1, 1], [], []>} : vector<128x128xbf16>, vector<128x256xbf16>, vector<128x256xf32> -> vector<128x256xf32>
    %21 = vector.broadcast %1 : vector<128x1xf32> to vector<128x256xf32>
    %22 = arith.addf %20, %21 : vector<128x256xf32>
    %cst_18 = arith.constant 0.000000e+00 : f32
    %23 = vector.broadcast %cst_18 : f32 to vector<128x256xf32>
    %24 = arith.maximumf %22, %23 : vector<128x256xf32>
    %25 = arith.truncf %24 : vector<128x256xf32> to vector<128x256xbf16>
    %cst_19 = arith.constant dense<0.000000e+00> : vector<128x256xf32>
    %26 = tpu.matmul %2, %25, %cst_19 {dimension_numbers = #tpu.dot_dimension_numbers<[1], [0], [0], [1], [0, 0, 1, 1], [], []>} : vector<128x128xbf16>, vector<128x256xbf16>, vector<128x256xf32> -> vector<128x256xf32>
    %27 = vector.broadcast %3 : vector<128x1xf32> to vector<128x256xf32>
    %28 = arith.addf %26, %27 : vector<128x256xf32>
    %c1_20 = arith.constant 1 : index
    %c0_21 = arith.constant 0 : index
    %c0_22 = arith.constant 0 : index
    %29 = vector.load %arg6[%c1_20, %c0_21, %c0_22] : memref<4x128x256xf32, #tpu.memory_space<vmem>>, vector<1x128x256xf32>
    %30 = vector.shape_cast %29 : vector<1x128x256xf32> to vector<128x256xf32>
    %31 = vector.shape_cast %28 : vector<128x256xf32> to vector<1x128x256xf32>
    tpu.vector_store %arg6[%c1_20, %c0_21, %c0_22], %31 {strides = array<i32>} : memref<4x128x256xf32, #tpu.memory_space<vmem>>, vector<1x128x256xf32>,
    %c2 = arith.constant 2 : index
    %c0_23 = arith.constant 0 : index
    %c0_24 = arith.constant 0 : index
    %32 = vector.load %arg1[%c2, %c0_23, %c0_24] : memref<4x128x256xbf16, #tpu.memory_space<vmem>>, vector<1x128x256xbf16>
    %33 = vector.shape_cast %32 : vector<1x128x256xbf16> to vector<128x256xbf16>
    %cst_25 = arith.constant dense<0.000000e+00> : vector<128x256xf32>
    %34 = tpu.matmul %0, %33, %cst_25 {dimension_numbers = #tpu.dot_dimension_numbers<[1], [0], [0], [1], [0, 0, 1, 1], [], []>} : vector<128x128xbf16>, vector<128x256xbf16>, vector<128x256xf32> -> vector<128x256xf32>
    %35 = vector.broadcast %1 : vector<128x1xf32> to vector<128x256xf32>
    %36 = arith.addf %34, %35 : vector<128x256xf32>
    %cst_26 = arith.constant 0.000000e+00 : f32
    %37 = vector.broadcast %cst_26 : f32 to vector<128x256xf32>
    %38 = arith.maximumf %36, %37 : vector<128x256xf32>
    %39 = arith.truncf %38 : vector<128x256xf32> to vector<128x256xbf16>
    %cst_27 = arith.constant dense<0.000000e+00> : vector<128x256xf32>
    %40 = tpu.matmul %2, %39, %cst_27 {dimension_numbers = #tpu.dot_dimension_numbers<[1], [0], [0], [1], [0, 0, 1, 1], [], []>} : vector<128x128xbf16>, vector<128x256xbf16>, vector<128x256xf32> -> vector<128x256xf32>
    %41 = vector.broadcast %3 : vector<128x1xf32> to vector<128x256xf32>
    %42 = arith.addf %40, %41 : vector<128x256xf32>
    %c2_28 = arith.constant 2 : index
    %c0_29 = arith.constant 0 : index
    %c0_30 = arith.constant 0 : index
    %43 = vector.load %arg6[%c2_28, %c0_29, %c0_30] : memref<4x128x256xf32, #tpu.memory_space<vmem>>, vector<1x128x256xf32>
    %44 = vector.shape_cast %43 : vector<1x128x256xf32> to vector<128x256xf32>
    %45 = vector.shape_cast %42 : vector<128x256xf32> to vector<1x128x256xf32>
    tpu.vector_store %arg6[%c2_28, %c0_29, %c0_30], %45 {strides = array<i32>} : memref<4x128x256xf32, #tpu.memory_space<vmem>>, vector<1x128x256xf32>,
    %c3 = arith.constant 3 : index
    %c0_31 = arith.constant 0 : index
    %c0_32 = arith.constant 0 : index
    %46 = vector.load %arg1[%c3, %c0_31, %c0_32] : memref<4x128x256xbf16, #tpu.memory_space<vmem>>, vector<1x128x256xbf16>
    %47 = vector.shape_cast %46 : vector<1x128x256xbf16> to vector<128x256xbf16>
    %cst_33 = arith.constant dense<0.000000e+00> : vector<128x256xf32>
    %48 = tpu.matmul %0, %47, %cst_33 {dimension_numbers = #tpu.dot_dimension_numbers<[1], [0], [0], [1], [0, 0, 1, 1], [], []>} : vector<128x128xbf16>, vector<128x256xbf16>, vector<128x256xf32> -> vector<128x256xf32>
    %49 = vector.broadcast %1 : vector<128x1xf32> to vector<128x256xf32>
    %50 = arith.addf %48, %49 : vector<128x256xf32>
    %cst_34 = arith.constant 0.000000e+00 : f32
    %51 = vector.broadcast %cst_34 : f32 to vector<128x256xf32>
    %52 = arith.maximumf %50, %51 : vector<128x256xf32>
    %53 = arith.truncf %52 : vector<128x256xf32> to vector<128x256xbf16>
    %cst_35 = arith.constant dense<0.000000e+00> : vector<128x256xf32>
    %54 = tpu.matmul %2, %53, %cst_35 {dimension_numbers = #tpu.dot_dimension_numbers<[1], [0], [0], [1], [0, 0, 1, 1], [], []>} : vector<128x128xbf16>, vector<128x256xbf16>, vector<128x256xf32> -> vector<128x256xf32>
    %55 = vector.broadcast %3 : vector<128x1xf32> to vector<128x256xf32>
    %56 = arith.addf %54, %55 : vector<128x256xf32>
    %c3_36 = arith.constant 3 : index
    %c0_37 = arith.constant 0 : index
    %c0_38 = arith.constant 0 : index
    %57 = vector.load %arg6[%c3_36, %c0_37, %c0_38] : memref<4x128x256xf32, #tpu.memory_space<vmem>>, vector<1x128x256xf32>
    %58 = vector.shape_cast %57 : vector<1x128x256xf32> to vector<128x256xf32>
    %59 = vector.shape_cast %56 : vector<128x256xf32> to vector<1x128x256xf32>
    tpu.vector_store %arg6[%c3_36, %c0_37, %c0_38], %59 {strides = array<i32>} : memref<4x128x256xf32, #tpu.memory_space<vmem>>, vector<1x128x256xf32>,
    return
  }
  func.func @transform_0(%arg0: i32) -> (i32, i32, i32) {
    %c0_i32 = arith.constant 0 : i32
    %c0_i32_0 = arith.constant 0 : i32
    %c0_i32_1 = arith.constant 0 : i32
    return %arg0, %c0_i32, %c0_i32_0 : i32, i32, i32
  }
  func.func @transform_1(%arg0: i32) -> (i32, i32) {
    %c0_i32 = arith.constant 0 : i32
    %c0_i32_0 = arith.constant 0 : i32
    %c0_i32_1 = arith.constant 0 : i32
    return %c0_i32, %c0_i32_0 : i32, i32
  }
  func.func @transform_2(%arg0: i32) -> (i32, i32) {
    %c0_i32 = arith.constant 0 : i32
    %c0_i32_0 = arith.constant 0 : i32
    %c0_i32_1 = arith.constant 0 : i32
    return %c0_i32, %c0_i32_0 : i32, i32
  }
  func.func @transform_3(%arg0: i32) -> (i32, i32) {
    %c0_i32 = arith.constant 0 : i32
    %c0_i32_0 = arith.constant 0 : i32
    %c0_i32_1 = arith.constant 0 : i32
    return %c0_i32, %c0_i32_0 : i32, i32
  }
  func.func @transform_4(%arg0: i32) -> (i32, i32) {
    %c0_i32 = arith.constant 0 : i32
    %c0_i32_0 = arith.constant 0 : i32
    %c0_i32_1 = arith.constant 0 : i32
    return %c0_i32, %c0_i32_0 : i32, i32
  }
  func.func @transform_5(%arg0: i32) -> (i32, i32, i32) {
    %c0_i32 = arith.constant 0 : i32
    %c0_i32_0 = arith.constant 0 : i32
    %c0_i32_1 = arith.constant 0 : i32
    return %arg0, %c0_i32, %c0_i32_0 : i32, i32, i32
  }
}

</mosaic_0001>

<bundles_post_ra>
// kernel: ffn_forward.1
= control target key start
LH: loop header
LB: loop body
LE: loop exit
PB: predicated region body
PF: predicated region fallthrough
CT: control target
= control target key end

     0   :  { %s2627_s18 = smov 0   ;;  %s3626_s0 = inlined_call_operand.vmem [shape: bf16[16,128,256], index: 0, kind: input, shape index: {}]   ;;  %s3627_s1 = inlined_call_operand.vmem [shape: bf16[128,128], index: 1, kind: input, shape index: {}]   ;;  %s3628_s2 = inlined_call_operand.vmem [shape: f32[128,1], index: 2, kind: input, shape index: {}]   ;;  %s3629_s3 = inlined_call_operand.vmem [shape: bf16[128,128], index: 3, kind: input, shape index: {}]   ;;  %s3630_s4 = inlined_call_operand.vmem [shape: f32[128,1], index: 4, kind: input, shape index: {}]   ;;  %s3631_s5 = inlined_call_operand.vmem [shape: f32[16,128,256], index: 5, kind: output, shape index: {}]  }
   0x1 LB: > { %s2226_s19 = sadd.s32 4294967295, %s2594_s18   ;;  %p2230_p0 = scmp.ge.s32.totalorder %s2594_s18, 1  ;;  %s2594_s18 = sphi %s2627_s18, %s15_s18  }
   0x2   : > { %p189_p1 = scmp.lt.s32.totalorder %s2594_s18, 5 }
   0x4   : > { %p190_p2 = pnand %p2230_p0, %p189_p1 }
   0x6   : > { %193 = sbr.rel (%p190_p2) target bundleno = 793 (0x319), region = 40 }
   0xb   : > { %s2231_s20 = sshll.u32 %s2226_s19, 2  ;;  %v3632_v0 = vmov 0   ;;  %v264_v1 = vld [vmem:[%s3628_s2 + $0x70] sm:$0xff]  ;;  %v265_v2 = vld [vmem:[%s3628_s2 + $0x78] sm:$0xff]  ;;  %v262_v14 = vld [vmem:[%s3628_s2 + $0x60] sm:$0xff] }
   0xc   : > { %p220_p3 = scmp.lt.s32.totalorder %s2231_s20, 15  ;;  %554 = vmatprep.mubr.bf16.mxu0 %v3632_v0  ;;  %2474 = vset.pattern.permute.xlu0 %v3632_v0  ;;  %v263_v16 = vld [vmem:[%s3628_s2 + $0x68] sm:$0xff]  ;;  %v260_v17 = vld [vmem:[%s3628_s2 + $0x50] sm:$0xff]  ;;  %v258_v19 = vld [vmem:[%s3628_s2 + $0x40] sm:$0xff] }
   0xd   : > { %2475 = vset.pattern.permute.xlu1 %v3632_v0  ;;  %843 = vmatprep.mubr.bf16.mxu1 %v3632_v0  ;;  %v261_v20 = vld [vmem:[%s3628_s2 + $0x58] sm:$0xff]  ;;  %v256_v23 = vld [vmem:[%s3628_s2 + $0x30] sm:$0xff]  ;;  %v259_v24 = vld [vmem:[%s3628_s2 + $0x48] sm:$0xff] }
   0xe   : > { %s3657_s20 = smov (!%p220_p3, %s2231_s20), 15  ;;  %386 = vperm.xlu0 %2474, %v264_v1   ;;  %376 = vperm.xlu1 %2475, %v262_v14   ;;  %v254_v27 = vld [vmem:[%s3628_s2 + $0x20] sm:$0xff]  ;;  %v257_v29 = vld [vmem:[%s3628_s2 + $0x38] sm:$0xff]  ;;  %v252_v32 = vld [vmem:[%s3628_s2 + $0x10] sm:$0xff] }
   0xf   : > { %s2463_s21 = sshll.u32 %s3657_s20, 7  ;;  %v2697_v28 = vld [vmem:[%s3627_s1] sm:$0xff]   ;;  %v255_v33 = vld [vmem:[%s3628_s2 + $0x28] sm:$0xff]  ;;  %v253_v38 = vld [vmem:[%s3628_s2 + $0x18] sm:$0xff]  ;;  %s2464_s7 = sshll.u32 %s3657_s20, 8 }
  0x10   : > { %s2645_s24 = scalar_lea.vmem %s3626_s0, %s2463_s21  ;;  %v250_v36 = vld [vmem:[%s3628_s2] sm:$0xff]  ;;  %v2720_v37 = vld [vmem:[%s3627_s1 + $0x8] sm:$0xff]   ;;  %v2740_v45 = vld [vmem:[%s3627_s1 + $0x10] sm:$0xff]   ;;  %s3320_s10 = scalar_lea.vmem %s3631_s5, %s2464_s7 }
  0x11   : > { %v2476_v3 = vld [vmem:[%s2645_s24 + $0x74] ss:$8 sps:$4 sm:$0xff]   ;;  %v2478_v4 = vld [vmem:[%s2645_s24 + $0x70] ss:$8 sps:$4 sm:$0xff]   ;;  %v2479_v5 = vld [vmem:[%s2645_s24 + $0x64] ss:$8 sps:$4 sm:$0xff]  }
  0x12   : > { %522 = vmatprep.subr.bf16.mxu0 %v2476_v3  ;;  %v2481_v6 = vld [vmem:[%s2645_s24 + $0x60] ss:$8 sps:$4 sm:$0xff]   ;;  %v2482_v7 = vld [vmem:[%s2645_s24 + $0x54] ss:$8 sps:$4 sm:$0xff]   ;;  %391 = vperm.xlu0 %2474, %v265_v2   ;;  %v2484_v8 = vld [vmem:[%s2645_s24 + $0x50] ss:$8 sps:$4 sm:$0xff]  }
  0x13   : > { %523 = vmatpush1.bf16.msra.mxu0 %v2478_v4  ;;  %v2485_v9 = vld [vmem:[%s2645_s24 + $0x44] ss:$8 sps:$4 sm:$0xff]   ;;  %v2487_v10 = vld [vmem:[%s2645_s24 + $0x40] ss:$8 sps:$4 sm:$0xff]   ;;  %v2488_v11 = vld [vmem:[%s2645_s24 + $0x34] ss:$8 sps:$4 sm:$0xff]   ;;  %381 = vperm.xlu1 %2475, %v263_v16  }
  0x14   : > { %524 = vmatprep.subr.bf16.mxu0 %v2479_v5  ;;  %v2490_v12 = vld [vmem:[%s2645_s24 + $0x30] ss:$8 sps:$4 sm:$0xff]   ;;  %v2491_v13 = vld [vmem:[%s2645_s24 + $0x24] ss:$8 sps:$4 sm:$0xff]   ;;  %v2493_v15 = vld [vmem:[%s2645_s24 + $0x20] ss:$8 sps:$4 sm:$0xff]  }
  0x15   : > { %v2494_v18 = vld [vmem:[%s2645_s24 + $0x14] ss:$8 sps:$4 sm:$0xff]   ;;  %v2496_v21 = vld [vmem:[%s2645_s24 + $0x10] ss:$8 sps:$4 sm:$0xff]   ;;  %v2497_v22 = vld [vmem:[%s2645_s24 + $0x4] ss:$8 sps:$4 sm:$0xff]  }
  0x16   : > { %366 = vperm.xlu0 %2474, %v260_v17   ;;  %v2499_v25 = vld [vmem:[%s2645_s24] ss:$8 sps:$4 sm:$0xff]   ;;  %v2507_v26 = vld [vmem:[%s2645_s24 + $0xf4] ss:$8 sps:$4 sm:$0xff]   ;;  %v2505_v30 = vld [vmem:[%s2645_s24 + $0xf0] ss:$8 sps:$4 sm:$0xff]  }
  0x17   : > { %525 = vmatpush1.bf16.msra.mxu0 %v2481_v6  ;;  %371 = vperm.xlu1 %2475, %v261_v20   ;;  %v2510_v31 = vld [vmem:[%s2645_s24 + $0xe4] ss:$8 sps:$4 sm:$0xff]   ;;  %v2508_v34 = vld [vmem:[%s2645_s24 + $0xe0] ss:$8 sps:$4 sm:$0xff]   ;;  %v2514_v35 = vld [vmem:[%s2645_s24 + $0xd4] ss:$8 sps:$4 sm:$0xff]  }
  0x18   : > { %526 = vmatprep.subr.bf16.mxu0 %v2482_v7  ;;  %v2512_v39 = vld [vmem:[%s2645_s24 + $0xd0] ss:$8 sps:$4 sm:$0xff]   ;;  %v2517_v40 = vld [vmem:[%s2645_s24 + $0xc4] ss:$8 sps:$4 sm:$0xff]   ;;  %v2515_v43 = vld [vmem:[%s2645_s24 + $0xc0] ss:$8 sps:$4 sm:$0xff]  }
  0x19   : > { %v282_v41 = vld [vmem:[%s3630_s4] sm:$0xff]  ;;  %v251_v42 = vld [vmem:[%s3628_s2 + $0x8] sm:$0xff]  ;;  %v2521_v44 = vld [vmem:[%s2645_s24 + $0xb4] ss:$8 sps:$4 sm:$0xff]  }
  0x1a   : > { %356 = vperm.xlu0 %2474, %v258_v19   ;;  %v283_v46 = vld [vmem:[%s3630_s4 + $0x8] sm:$0xff]  ;;  %v284_v47 = vld [vmem:[%s3630_s4 + $0x10] sm:$0xff]  ;;  %v286_v50 = vld [vmem:[%s3630_s4 + $0x20] sm:$0xff] }
  0x1b   : > { %527 = vmatpush1.bf16.msra.mxu0 %v2484_v8  ;;  %361 = vperm.xlu1 %2475, %v259_v24   ;;  %v2519_v48 = vld [vmem:[%s2645_s24 + $0xb0] ss:$8 sps:$4 sm:$0xff]   ;;  %v2524_v49 = vld [vmem:[%s2645_s24 + $0xa4] ss:$8 sps:$4 sm:$0xff]   ;;  %v2522_v52 = vld [vmem:[%s2645_s24 + $0xa0] ss:$8 sps:$4 sm:$0xff]  }
  0x1c   : > { %528 = vmatprep.subr.bf16.mxu0 %v2485_v9  ;;  %v285_v51 = vld [vmem:[%s3630_s4 + $0x18] sm:$0xff]  ;;  %v288_v54 = vld [vmem:[%s3630_s4 + $0x30] sm:$0xff]  ;;  %v287_v56 = vld [vmem:[%s3630_s4 + $0x28] sm:$0xff] }
  0x1d   : > { %v2528_v53 = vld [vmem:[%s2645_s24 + $0x94] ss:$8 sps:$4 sm:$0xff]   ;;  %v2526_v57 = vld [vmem:[%s2645_s24 + $0x90] ss:$8 sps:$4 sm:$0xff]   ;;  %v2531_v58 = vld [vmem:[%s2645_s24 + $0x84] ss:$8 sps:$4 sm:$0xff]  }
  0x1e   : > { %346 = vperm.xlu0 %2474, %v256_v23   ;;  %v2766_v55 = vld [vmem:[%s3627_s1 + $0x18] sm:$0xff]   ;;  %v290_v59 = vld [vmem:[%s3630_s4 + $0x40] sm:$0xff]  ;;  %v292_v63 = vld [vmem:[%s3630_s4 + $0x50] sm:$0xff] }
  0x1f   : > { %529 = vmatpush1.bf16.msra.mxu0 %v2487_v10  ;;  %351 = vperm.xlu1 %2475, %v257_v29   ;;  %v289_v60 = vld [vmem:[%s3630_s4 + $0x38] sm:$0xff]  ;;  %v2529_v61 = vld [vmem:[%s2645_s24 + $0x80] ss:$8 sps:$4 sm:$0xff]   ;;  %v296_v5 = vld [vmem:[%s3630_s4 + $0x70] sm:$0xff] }
  0x20   : > { %530 = vmatprep.subr.bf16.mxu0 %v2488_v11  ;;  %v2534_v62 = vld [vmem:[%s2645_s24 + $0x174] ss:$8 sps:$4 sm:$0xff]   ;;  %v2789_v1 = vld [vmem:[%s3627_s1 + $0x20] sm:$0xff]   ;;  %v291_v2 = vld [vmem:[%s3630_s4 + $0x48] sm:$0xff] }
  0x21   : > { %v294_v3 = vld [vmem:[%s3630_s4 + $0x60] sm:$0xff]  ;;  %v293_v4 = vld [vmem:[%s3630_s4 + $0x58] sm:$0xff]  ;;  %v2808_v6 = vld [vmem:[%s3627_s1 + $0x28] sm:$0xff]  }
  0x22   : > { %336 = vperm.xlu0 %2474, %v254_v27   ;;  %v295_v7 = vld [vmem:[%s3630_s4 + $0x68] sm:$0xff]  ;;  %v297_v8 = vld [vmem:[%s3630_s4 + $0x78] sm:$0xff]  ;;  %v2821_v9 = vld [vmem:[%s3627_s1 + $0x30] sm:$0xff]  }
  0x23   : > { %531 = vmatpush1.bf16.msra.mxu0 %v2490_v12  ;;  %341 = vperm.xlu1 %2475, %v255_v33   ;;  %v2828_v10 = vld [vmem:[%s3627_s1 + $0x38] sm:$0xff]   ;;  %v2537_v12 = vld [vmem:[%s2645_s24 + $0x164] ss:$8 sps:$4 sm:$0xff]   ;;  %v2541_v17 = vld [vmem:[%s2645_s24 + $0x140] ss:$8 sps:$4 sm:$0xff]  }
  0x24   : > { %532 = vmatprep.subr.bf16.mxu0 %v2491_v13  ;;  %v2532_v11 = vld [vmem:[%s2645_s24 + $0x170] ss:$8 sps:$4 sm:$0xff]   ;;  %v2535_v13 = vld [vmem:[%s2645_s24 + $0x160] ss:$8 sps:$4 sm:$0xff]   ;;  %v2540_v14 = vld [vmem:[%s2645_s24 + $0x154] ss:$8 sps:$4 sm:$0xff]  }
  0x25   : > { %v2543_v16 = vld [vmem:[%s2645_s24 + $0x144] ss:$8 sps:$4 sm:$0xff]   ;;  %v2544_v19 = vld [vmem:[%s2645_s24 + $0x130] ss:$8 sps:$4 sm:$0xff]  }
  0x26   : > { %326 = vperm.xlu0 %2474, %v252_v32   ;;  %v2549_v20 = vld [vmem:[%s2645_s24 + $0x124] ss:$8 sps:$4 sm:$0xff]   ;;  %v2550_v23 = vld [vmem:[%s2645_s24 + $0x110] ss:$8 sps:$4 sm:$0xff]  }
  0x27   : > { %533 = vmatpush1.bf16.msra.mxu0 %v2493_v15  ;;  %331 = vperm.xlu1 %2475, %v253_v38   ;;  %v2538_v15 = vld [vmem:[%s2645_s24 + $0x150] ss:$8 sps:$4 sm:$0xff]   ;;  %v2555_v24 = vld [vmem:[%s2645_s24 + $0x104] ss:$8 sps:$4 sm:$0xff]  }
  0x28   : > { %534 = vmatprep.subr.bf16.mxu0 %v2494_v18  ;;  %v2546_v18 = vld [vmem:[%s2645_s24 + $0x134] ss:$8 sps:$4 sm:$0xff]   ;;  %v2556_v27 = vld [vmem:[%s2645_s24 + $0x1f0] ss:$8 sps:$4 sm:$0xff]   ;;  %v2561_v29 = vld [vmem:[%s2645_s24 + $0x1e4] ss:$8 sps:$4 sm:$0xff]  }
  0x29   : > { %v2562_v32 = vld [vmem:[%s2645_s24 + $0x1d0] ss:$8 sps:$4 sm:$0xff]   ;;  %v2567_v33 = vld [vmem:[%s2645_s24 + $0x1c4] ss:$8 sps:$4 sm:$0xff]  }
  0x2a   : > { %316 = vperm.xlu0 %2474, %v250_v36   ;;  %v2568_v36 = vld [vmem:[%s2645_s24 + $0x1b0] ss:$8 sps:$4 sm:$0xff]   ;;  %v2573_v38 = vld [vmem:[%s2645_s24 + $0x1a4] ss:$8 sps:$4 sm:$0xff]  }
  0x2b   : > { %535 = vmatpush1.bf16.msra.mxu0 %v2496_v21  ;;  %321 = vperm.xlu1 %2475, %v251_v42   ;;  %v2547_v21 = vld [vmem:[%s2645_s24 + $0x120] ss:$8 sps:$4 sm:$0xff]  }
  0x2c   : > { %536 = vmatprep.subr.bf16.mxu0 %v2497_v22  ;;  %v2552_v22 = vld [vmem:[%s2645_s24 + $0x114] ss:$8 sps:$4 sm:$0xff]  }
  0x2e   : > { %685 = vperm.xlu0 %2474, %v282_v41   ;;  %v2574_v41 = vld [vmem:[%s2645_s24 + $0x190] ss:$8 sps:$4 sm:$0xff]  }
  0x2f   : > { %537 = vmatpush1.bf16.msra.mxu0 %v2499_v25  ;;  %690 = vperm.xlu1 %2475, %v283_v46   ;;  %v2553_v25 = vld [vmem:[%s2645_s24 + $0x100] ss:$8 sps:$4 sm:$0xff]  }
  0x30   : > { %1053 = vmatprep.subr.bf16.mxu0 %v2507_v26  ;;  %v2558_v26 = vld [vmem:[%s2645_s24 + $0x1f4] ss:$8 sps:$4 sm:$0xff]   ;;  %v2577_v46 = vld [vmem:[%s2645_s24 + $0x180] ss:$8 sps:$4 sm:$0xff]  }
  0x32   : > { %555 = vmatmul.mubr.bf16.vlgmr.msra.gmra.mxu0 %v2697_v28  ;;  %695 = vperm.xlu0 %2474, %v284_v47  }
  0x33   : > { %564 = vmatprep.mubr.bf16.mxu0 %v3632_v0  ;;  %1054 = vmatpush1.bf16.msra.mxu0 %v2505_v30  ;;  %v2559_v30 = vld [vmem:[%s2645_s24 + $0x1e0] ss:$8 sps:$4 sm:$0xff]  }
  0x34   : > { %1055 = vmatprep.subr.bf16.mxu0 %v2510_v31  ;;  %700 = vperm.xlu1 %2475, %v285_v51   ;;  %v2564_v31 = vld [vmem:[%s2645_s24 + $0x1d4] ss:$8 sps:$4 sm:$0xff]  }
  0x36   : > { %705 = vperm.xlu0 %2474, %v286_v50  }
  0x37   : > { %1056 = vmatpush1.bf16.msra.mxu0 %v2508_v34  ;;  %v2565_v34 = vld [vmem:[%s2645_s24 + $0x1c0] ss:$8 sps:$4 sm:$0xff]  }
  0x38   : > { %1057 = vmatprep.subr.bf16.mxu0 %v2514_v35  ;;  %710 = vperm.xlu1 %2475, %v287_v56   ;;  %v2570_v35 = vld [vmem:[%s2645_s24 + $0x1b4] ss:$8 sps:$4 sm:$0xff]  }
  0x3a   : > { %565 = vmatmul.mubr.bf16.gmra.mxu0 %v2720_v37  ;;  %715 = vperm.xlu0 %2474, %v288_v54  }
  0x3b   : > { %574 = vmatprep.mubr.bf16.mxu0 %v3632_v0  ;;  %1058 = vmatpush1.bf16.msra.mxu0 %v2512_v39  ;;  %v2571_v39 = vld [vmem:[%s2645_s24 + $0x1a0] ss:$8 sps:$4 sm:$0xff]  }
  0x3c   : > { %1059 = vmatprep.subr.bf16.mxu0 %v2517_v40  ;;  %720 = vperm.xlu1 %2475, %v289_v60   ;;  %v2576_v40 = vld [vmem:[%s2645_s24 + $0x194] ss:$8 sps:$4 sm:$0xff]  }
  0x3e   : > { %725 = vperm.xlu0 %2474, %v290_v59  }
  0x3f   : > { %1060 = vmatpush1.bf16.msra.mxu0 %v2515_v43  ;;  %v2579_v43 = vld [vmem:[%s2645_s24 + $0x184] ss:$8 sps:$4 sm:$0xff]  }
  0x40   : > { %1061 = vmatprep.subr.bf16.mxu0 %v2521_v44  ;;  %730 = vperm.xlu1 %2475, %v291_v2  }
  0x42   : > { %575 = vmatmul.mubr.bf16.gmra.mxu0 %v2740_v45  ;;  %735 = vperm.xlu0 %2474, %v292_v63  }
  0x43   : > { %584 = vmatprep.mubr.bf16.mxu0 %v3632_v0  ;;  %1062 = vmatpush1.bf16.msra.mxu0 %v2519_v48 }
  0x44   : > { %1063 = vmatprep.subr.bf16.mxu0 %v2524_v49  ;;  %740 = vperm.xlu1 %2475, %v293_v4  }
  0x46   : > { %745 = vperm.xlu0 %2474, %v294_v3  }
  0x47   : > { %1064 = vmatpush1.bf16.msra.mxu0 %v2522_v52 }
  0x48   : > { %1065 = vmatprep.subr.bf16.mxu0 %v2528_v53  ;;  %750 = vperm.xlu1 %2475, %v295_v7  }
  0x4a   : > { %585 = vmatmul.mubr.bf16.gmra.mxu0 %v2766_v55  ;;  %755 = vperm.xlu0 %2474, %v296_v5  }
  0x4b   : > { %594 = vmatprep.mubr.bf16.mxu0 %v3632_v0  ;;  %1066 = vmatpush1.bf16.msra.mxu0 %v2526_v57 }
  0x4c   : > { %1067 = vmatprep.subr.bf16.mxu0 %v2531_v58  ;;  %760 = vperm.xlu1 %2475, %v297_v8  }
  0x4f   : > { %1068 = vmatpush1.bf16.msra.mxu0 %v2529_v61 }
  0x50   : > { %1457 = vmatprep.subr.bf16.mxu0 %v2534_v62 }
  0x52   : > { %595 = vmatmul.mubr.bf16.gmra.mxu0 %v2789_v1 }
  0x53   : > { %604 = vmatprep.mubr.bf16.mxu0 %v3632_v0 }
  0x5a   : > { %605 = vmatmul.mubr.bf16.gmra.mxu0 %v2808_v6 }
  0x5b   : > { %614 = vmatprep.mubr.bf16.mxu0 %v3632_v0 }
  0x62   : > { %615 = vmatmul.mubr.bf16.gmra.mxu0 %v2821_v9 }
  0x63   : > { %624 = vmatprep.mubr.bf16.mxu0 %v3632_v0 }
  0x6a   : > { %625 = vmatmul.mubr.bf16.gmra.mxu0 %v2828_v10 }
  0x6b   : > { %1085 = vmatprep.mubr.bf16.mxu0 %v3632_v0 }
  0x72   : > { %1086 = vmatmul.mubr.bf16.vlgmr.msra.gmra.mxu0 %v2697_v28 }
  0x73   : > { %1095 = vmatprep.mubr.bf16.mxu0 %v3632_v0  ;;  %1458 = vmatpush1.bf16.msra.mxu0 %v2532_v11 }
  0x74   : > { %1459 = vmatprep.subr.bf16.mxu0 %v2537_v12 }
  0x77   : > { %1460 = vmatpush1.bf16.msra.mxu0 %v2535_v13 }
  0x78   : > { %1461 = vmatprep.subr.bf16.mxu0 %v2540_v14 }
  0x7a   : > { %1096 = vmatmul.mubr.bf16.gmra.mxu0 %v2720_v37 }
  0x7b   : > { %1105 = vmatprep.mubr.bf16.mxu0 %v3632_v0  ;;  %1462 = vmatpush1.bf16.msra.mxu0 %v2538_v15 }
  0x7c   : > { %1463 = vmatprep.subr.bf16.mxu0 %v2543_v16 }
  0x7f   : > { %1464 = vmatpush1.bf16.msra.mxu0 %v2541_v17 }
  0x80   : > { %1465 = vmatprep.subr.bf16.mxu0 %v2546_v18 }
  0x82   : > { %1106 = vmatmul.mubr.bf16.gmra.mxu0 %v2740_v45 }
  0x83   : > { %1115 = vmatprep.mubr.bf16.mxu0 %v3632_v0  ;;  %1466 = vmatpush1.bf16.msra.mxu0 %v2544_v19 }
  0x84   : > { %1467 = vmatprep.subr.bf16.mxu0 %v2549_v20 }
  0x87   : > { %1468 = vmatpush1.bf16.msra.mxu0 %v2547_v21 }
  0x88   : > { %1469 = vmatprep.subr.bf16.mxu0 %v2552_v22 }
  0x89   : > { %v2883_v42 = vpop.permute.xlu0 %386  ;;  %v2887_v44 = vpop.permute.xlu1 %376 }
  0x8a   : > { %1116 = vmatmul.mubr.bf16.gmra.mxu0 %v2766_v55  ;;  %3644 = vst [vmem:[#allocation2_spill] sm:$0xff] %v2883_v42 }
  0x8b   : > { %1125 = vmatprep.mubr.bf16.mxu0 %v3632_v0  ;;  %1470 = vmatpush1.bf16.msra.mxu0 %v2550_v23 }
  0x8c   : > { %1471 = vmatprep.subr.bf16.mxu0 %v2555_v24 }
  0x8d   : > { %v2891_v47 = vpop.permute.xlu0 %391 }
  0x8e   : > { %3645 = vst [vmem:[#allocation3_spill] sm:$0xff] %v2891_v47  ;;  %v2893_v48 = vpop.permute.xlu1 %381 }
  0x8f   : > { %1472 = vmatpush1.bf16.msra.mxu0 %v2553_v25 }
  0x90   : > { %1861 = vmatprep.subr.bf16.mxu0 %v2558_v26 }
  0x91   : > { %v2897_v49 = vpop.permute.xlu0 %366 }
  0x92   : > { %1126 = vmatmul.mubr.bf16.gmra.mxu0 %v2789_v1  ;;  %v2899_v50 = vpop.permute.xlu1 %371 }
  0x93   : > { %1135 = vmatprep.mubr.bf16.mxu0 %v3632_v0 }
  0x95   : > { %v2902_v51 = vpop.permute.xlu0 %356 }
  0x96   : > { %v2905_v52 = vpop.permute.xlu1 %361 }
  0x99   : > { %v2907_v53 = vpop.permute.xlu0 %346 }
  0x9a   : > { %1136 = vmatmul.mubr.bf16.gmra.mxu0 %v2808_v6  ;;  %v2910_v54 = vpop.permute.xlu1 %351 }
  0x9b   : > { %1145 = vmatprep.mubr.bf16.mxu0 %v3632_v0 }
  0x9d   : > { %v2913_v56 = vpop.permute.xlu0 %336 }
  0x9e   : > { %v2915_v57 = vpop.permute.xlu1 %341 }
  0xa1   : > { %v2919_v58 = vpop.permute.xlu0 %326 }
  0xa2   : > { %1146 = vmatmul.mubr.bf16.gmra.mxu0 %v2821_v9  ;;  %v2921_v59 = vpop.permute.xlu1 %331 }
  0xa3   : > { %1155 = vmatprep.mubr.bf16.mxu0 %v3632_v0 }
  0xa5   : > { %v2923_v60 = vpop.permute.xlu0 %316 }
  0xa6   : > { %v2927_v63 = vpop.permute.xlu1 %321 }
  0xaa   : > { %1156 = vmatmul.mubr.bf16.gmra.mxu0 %v2828_v10 }
  0xab   : > { %1489 = vmatprep.mubr.bf16.mxu0 %v3632_v0 }
  0xb2   : > { %1490 = vmatmul.mubr.bf16.vlgmr.msra.gmra.mxu0 %v2697_v28 }
  0xb3   : > { %1499 = vmatprep.mubr.bf16.mxu0 %v3632_v0  ;;  %1862 = vmatpush1.bf16.msra.mxu0 %v2556_v27 }
  0xb4   : > { %1863 = vmatprep.subr.bf16.mxu0 %v2561_v29 }
  0xb7   : > { %1864 = vmatpush1.bf16.msra.mxu0 %v2559_v30 }
  0xb8   : > { %1865 = vmatprep.subr.bf16.mxu0 %v2564_v31 }
  0xba   : > { %1500 = vmatmul.mubr.bf16.gmra.mxu0 %v2720_v37 }
  0xbb   : > { %1509 = vmatprep.mubr.bf16.mxu0 %v3632_v0  ;;  %1866 = vmatpush1.bf16.msra.mxu0 %v2562_v32 }
  0xbc   : > { %1867 = vmatprep.subr.bf16.mxu0 %v2567_v33 }
  0xbf   : > { %1868 = vmatpush1.bf16.msra.mxu0 %v2565_v34 }
  0xc0   : > { %1869 = vmatprep.subr.bf16.mxu0 %v2570_v35 }
  0xc2   : > { %1510 = vmatmul.mubr.bf16.gmra.mxu0 %v2740_v45 }
  0xc3   : > { %1519 = vmatprep.mubr.bf16.mxu0 %v3632_v0  ;;  %1870 = vmatpush1.bf16.msra.mxu0 %v2568_v36 }
  0xc4   : > { %1871 = vmatprep.subr.bf16.mxu0 %v2573_v38 }
  0xc7   : > { %1872 = vmatpush1.bf16.msra.mxu0 %v2571_v39 }
  0xc8   : > { %1873 = vmatprep.subr.bf16.mxu0 %v2576_v40 }
  0xca   : > { %1520 = vmatmul.mubr.bf16.gmra.mxu0 %v2766_v55 }
  0xcb   : > { %1529 = vmatprep.mubr.bf16.mxu0 %v3632_v0  ;;  %1874 = vmatpush1.bf16.msra.mxu0 %v2574_v41 }
  0xcc   : > { %1875 = vmatprep.subr.bf16.mxu0 %v2579_v43 }
  0xcf   : > { %1876 = vmatpush1.bf16.msra.mxu0 %v2577_v46 }
  0xd2   : > { %1530 = vmatmul.mubr.bf16.gmra.mxu0 %v2789_v1 }
  0xd3   : > { %1539 = vmatprep.mubr.bf16.mxu0 %v3632_v0 }
  0xda   : > { %1540 = vmatmul.mubr.bf16.gmra.mxu0 %v2808_v6 }
  0xdb   : > { %1549 = vmatprep.mubr.bf16.mxu0 %v3632_v0 }
  0xe2   : > { %1550 = vmatmul.mubr.bf16.gmra.mxu0 %v2821_v9 }
  0xe3   : > { %1559 = vmatprep.mubr.bf16.mxu0 %v3632_v0 }
  0xea   : > { %1560 = vmatmul.mubr.bf16.gmra.mxu0 %v2828_v10 }
  0xeb   : > { %1893 = vmatprep.mubr.bf16.mxu0 %v3632_v0 }
  0xf2   : > { %v556_v61 = vpop.f32.mrf.mxu0  ;;  %1894 = vmatmul.mubr.bf16.vlgmr.msra.gmra.mxu0 %v2697_v28 }
  0xf3   : > { %1903 = vmatprep.mubr.bf16.mxu0 %v3632_v0  ;;  %v557_v2 = vadd.f32 %v556_v61, %v2923_v60 }
  0xf4   : > { %v558_v62 = vpop.f32.mrf.mxu0 }
  0xf5   : > { %v559_v4 = vadd.f32 %v558_v62, %v2923_v60  ;;  %v635_v8 = vmax.f32 %v557_v2, 0.0 }
  0xf6   : > { %v560_v3 = vpop.f32.mrf.mxu0 }
  0xf7   : > { %v561_v5 = vadd.f32 %v560_v3, %v2927_v63  ;;  %v636_v28 = vmax.f32 %v559_v4, 0.0 }
  0xf8   : > { %v562_v7 = vpop.f32.mrf.mxu0 }
  0xf9   : > { %v637_v11 = vmax.f32 %v561_v5, 0.0  ;;  %v563_v12 = vadd.f32 %v562_v7, %v2927_v63 }
  0xfa   : > { %v566_v13 = vpop.f32.mrf.mxu0  ;;  %1904 = vmatmul.mubr.bf16.gmra.mxu0 %v2720_v37 }
  0xfb   : > { %v2934_v14 = vpack.c.bf16 %v637_v11, %v635_v8  ;;  %v638_v15 = vmax.f32 %v563_v12, 0.0  ;;  %1913 = vmatprep.mubr.bf16.mxu0 %v3632_v0  ;;  %v567_v17 = vadd.f32 %v566_v13, %v2919_v58 }
  0xfc   : > { %v568_v16 = vpop.f32.mrf.mxu0 }
  0xfd   : > { %v2938_v18 = vpack.c.bf16 %v638_v15, %v636_v28  ;;  %v569_v20 = vadd.f32 %v568_v16, %v2919_v58  ;;  %v639_v23 = vmax.f32 %v567_v17, 0.0 }
  0xfe   : > { %v570_v19 = vpop.f32.mrf.mxu0 }
  0xff   : > { %v571_v21 = vadd.f32 %v570_v19, %v2921_v59  ;;  %v640_v26 = vmax.f32 %v569_v20, 0.0 }
 0x100   : > { %v572_v22 = vpop.f32.mrf.mxu0 }
 0x101   : > { %v641_v24 = vmax.f32 %v571_v21, 0.0  ;;  %v573_v37 = vadd.f32 %v572_v22, %v2921_v59 }
 0x102   : > { %v2943_v25 = vpop.f32.mrf.mxu0  ;;  %1914 = vmatmul.mubr.bf16.gmra.mxu0 %v2740_v45 }
 0x103   : > { %v2946_v27 = vpack.c.bf16 %v641_v24, %v639_v23  ;;  %v642_v29 = vmax.f32 %v573_v37, 0.0  ;;  %1923 = vmatprep.mubr.bf16.mxu0 %v3632_v0 }
 0x104   : > { %v2949_v30 = vpop.f32.mrf.mxu0 }
 0x105   : > { %v2951_v31 = vpack.c.bf16 %v642_v29, %v640_v26 }
 0x106   : > { %v2953_v32 = vpop.f32.mrf.mxu0 }
 0x108   : > { %v2955_v33 = vpop.f32.mrf.mxu0 }
 0x10a   : > { %v2957_v34 = vpop.f32.mrf.mxu0  ;;  %1924 = vmatmul.mubr.bf16.gmra.mxu0 %v2766_v55 }
 0x10b   : > { %1933 = vmatprep.mubr.bf16.mxu0 %v3632_v0 }
 0x10c   : > { %v2961_v45 = vpop.f32.mrf.mxu0 }
 0x10e   : > { %v2963_v35 = vpop.f32.mrf.mxu0 }
 0x110   : > { %v592_v36 = vpop.f32.mrf.mxu0 }
 0x112   : > { %v2965_v38 = vpop.f32.mrf.mxu0  ;;  %1934 = vmatmul.mubr.bf16.gmra.mxu0 %v2789_v1 }
 0x113   : > { %1943 = vmatprep.mubr.bf16.mxu0 %v3632_v0 }
 0x114   : > { %v598_v39 = vpop.f32.mrf.mxu0 }
 0x116   : > { %v600_v40 = vpop.f32.mrf.mxu0 }
 0x118   : > { %v602_v41 = vpop.f32.mrf.mxu0 }
 0x11a   : > { %v606_v43 = vpop.f32.mrf.mxu0  ;;  %1944 = vmatmul.mubr.bf16.gmra.mxu0 %v2808_v6 }
 0x11b   : > { %1953 = vmatprep.mubr.bf16.mxu0 %v3632_v0 }
 0x11c   : > { %v608_v55 = vpop.f32.mrf.mxu0 }
 0x11d   : > { %v609_v37 = vadd.f32 %v608_v55, %v2897_v49  ;;  %v593_v55 = vadd.f32 %v592_v36, %v2910_v54 }
 0x11e   : > { %v610_v46 = vpop.f32.mrf.mxu0 }
 0x120   : > { %v612_v61 = vpop.f32.mrf.mxu0 }
 0x122   : > { %v616_v62 = vpop.f32.mrf.mxu0  ;;  %1954 = vmatmul.mubr.bf16.gmra.mxu0 %v2821_v9 }
 0x123   : > { %1963 = vmatprep.mubr.bf16.mxu0 %v3632_v0  ;;  %v617_v22 = vadd.f32 %v616_v62, %v2887_v44 }
 0x124   : > { %v618_v2 = vpop.f32.mrf.mxu0 }
 0x125   : > { %v619_v9 = vadd.f32 %v618_v2, %v2887_v44 }
 0x126   : > { %v620_v1 = vpop.f32.mrf.mxu0 }
 0x127   : > { %v621_v15 = vadd.f32 %v620_v1, %v2893_v48  ;;  %v660_v26 = vmax.f32 %v619_v9, 0.0  ;;  %v611_v1 = vadd.f32 %v610_v46, %v2899_v50  ;;  %v656_v46 = vmax.f32 %v609_v37, 0.0 }
 0x128   : > { %v622_v3 = vpop.f32.mrf.mxu0  ;;  %v589_v37 = vadd.f32 %v2961_v45, %v2907_v53 }
 0x129   : > { %v623_v6 = vadd.f32 %v622_v3, %v2893_v48  ;;  %v603_v3 = vadd.f32 %v602_v41, %v2905_v52 }
 0x12a   : > { %v626_v4 = vpop.f32.mrf.mxu0  ;;  %1964 = vmatmul.mubr.bf16.gmra.mxu0 %v2828_v10  ;;  %v613_v10 = vadd.f32 %v612_v61, %v2899_v50 }
 0x12b   : > { %v627_v12 = vadd.f32 %v626_v4, %v2883_v42  ;;  %v662_v19 = vmax.f32 %v623_v6, 0.0  ;;  %v661_v4 = vmax.f32 %v621_v15, 0.0 }
 0x12c   : > { %v628_v5 = vpop.f32.mrf.mxu0 }
 0x12d   : > { %v629_v8 = vadd.f32 %v628_v5, %v2883_v42  ;;  %v663_v23 = vmax.f32 %v627_v12, 0.0  ;;  %v680_v6 = vpack.c.bf16 %v662_v19, %v660_v26  ;;  %v607_v12 = vadd.f32 %v606_v43, %v2897_v49 }
 0x12e   : > { %v630_v7 = vpop.f32.mrf.mxu0 }
 0x12f   : > { %v631_v11 = vadd.f32 %v630_v7, %v2891_v47  ;;  %v664_v20 = vmax.f32 %v629_v8, 0.0  ;;  %v658_v7 = vmax.f32 %v613_v10, 0.0  ;;  %v657_v10 = vmax.f32 %v611_v1, 0.0 }
 0x130   : > { %v632_v13 = vpop.f32.mrf.mxu0 }
 0x131   : > { %v633_v28 = vadd.f32 %v632_v13, %v2891_v47  ;;  %v665_v16 = vmax.f32 %v631_v11, 0.0  ;;  %v599_v11 = vadd.f32 %v598_v39, %v2902_v51  ;;  %v659_v13 = vmax.f32 %v617_v22, 0.0 }
 0x132   : > { %v1087_v17 = vpop.f32.mrf.mxu0  ;;  %v678_v36 = vpack.c.bf16 %v658_v7, %v656_v46  ;;  %v597_v22 = vadd.f32 %v2965_v38, %v2902_v51 }
 0x133   : > { %v666_v21 = vmax.f32 %v633_v28, 0.0  ;;  %v1088_v29 = vadd.f32 %v1087_v17, %v2923_v60  ;;  %v681_v61 = vpack.c.bf16 %v665_v16, %v663_v23  ;;  %v601_v16 = vadd.f32 %v600_v40, %v2905_v52 }
 0x134   : > { %v1089_v24 = vpop.f32.mrf.mxu0  ;;  %v654_v17 = vmax.f32 %v603_v3, 0.0  ;;  %v679_v19 = vpack.c.bf16 %v661_v4, %v659_v13  ;;  %v655_v23 = vmax.f32 %v607_v12, 0.0  ;;  %v652_v26 = vmax.f32 %v599_v11, 0.0 }
 0x135   : > { %v682_v2 = vpack.c.bf16 %v666_v21, %v664_v20  ;;  %v1090_v8 = vadd.f32 %v1089_v24, %v2923_v60  ;;  %v1166_v9 = vmax.f32 %v1088_v29, 0.0  ;;  %v591_v3 = vadd.f32 %v2963_v35, %v2910_v54 }
 0x136   : > { %v1091_v5 = vpop.f32.mrf.mxu0  ;;  %v653_v1 = vmax.f32 %v601_v16, 0.0  ;;  %v677_v38 = vpack.c.bf16 %v657_v10, %v655_v23  ;;  %v648_v11 = vmax.f32 %v589_v37, 0.0 }
 0x137   : > { %v1092_v62 = vadd.f32 %v1091_v5, %v2927_v63  ;;  %811 = vmatprep.subr.bf16.mxu1 %v682_v2  ;;  %v1167_v21 = vmax.f32 %v1090_v8, 0.0  ;;  %v583_v2 = vadd.f32 %v2955_v33, %v2915_v57  ;;  %v650_v5 = vmax.f32 %v593_v55, 0.0 }
 0x138   : > { %812 = vmatpush1.bf16.msra.mxu1 %v681_v61  ;;  %v1093_v41 = vpop.f32.mrf.mxu0  ;;  %v676_v61 = vpack.c.bf16 %v654_v17, %v652_v26  ;;  %v587_v8 = vadd.f32 %v2957_v34, %v2907_v53  ;;  %v581_v55 = vadd.f32 %v2953_v32, %v2915_v57  ;;  %v649_v46 = vmax.f32 %v591_v3, 0.0 }
 0x139   : > { %v1168_v28 = vmax.f32 %v1092_v62, 0.0  ;;  %v1094_v15 = vadd.f32 %v1093_v41, %v2927_v63  ;;  %813 = vmatprep.subr.bf16.mxu1 %v680_v6  ;;  %v579_v6 = vadd.f32 %v2949_v30, %v2913_v56  ;;  %v651_v62 = vmax.f32 %v597_v22, 0.0 }
 0x13a   : > { %v1097_v20 = vpop.f32.mrf.mxu0  ;;  %v646_v41 = vmax.f32 %v583_v2, 0.0  ;;  %v674_v16 = vpack.c.bf16 %v650_v5, %v648_v11  ;;  %v577_v17 = vadd.f32 %v2943_v25, %v2913_v56  ;;  %v647_v10 = vmax.f32 %v587_v8, 0.0  ;;  %v3070_v11 = vld [vmem:[%s3629_s3 + $0x18] sm:$0xff]  }
 0x13b   : > { %v2994_v39 = vpack.c.bf16 %v1168_v28, %v1166_v9  ;;  %v1169_v43 = vmax.f32 %v1094_v15, 0.0  ;;  %v1098_v29 = vadd.f32 %v1097_v20, %v2919_v58  ;;  %v675_v9 = vpack.c.bf16 %v653_v1, %v651_v62  ;;  %v3046_v1 = vld [vmem:[%s3629_s3] sm:$0xff]   ;;  %3648 = vst [vmem:[#allocation6_spill] sm:$0xff] %v3070_v11 }
 0x13c   : > { %814 = vmatpush1.bf16.msra.mxu1 %v679_v19  ;;  %v1099_v24 = vpop.f32.mrf.mxu0  ;;  %v644_v20 = vmax.f32 %v579_v6, 0.0  ;;  %v645_v32 = vmax.f32 %v581_v55, 0.0  ;;  %v643_v23 = vmax.f32 %v577_v17, 0.0 }
 0x13d   : > { %v3000_v40 = vpack.c.bf16 %v1169_v43, %v1167_v21  ;;  %815 = vmatprep.subr.bf16.mxu1 %v678_v36  ;;  %v1100_v7 = vadd.f32 %v1099_v24, %v2919_v58  ;;  %v1170_v35 = vmax.f32 %v1098_v29, 0.0  ;;  %v673_v21 = vpack.c.bf16 %v649_v46, %v647_v10 }
 0x13e   : > { %v1101_v4 = vpop.f32.mrf.mxu0  ;;  %v672_v22 = vpack.c.bf16 %v646_v41, %v644_v20  ;;  %v671_v37 = vpack.c.bf16 %v645_v32, %v643_v23  ;;  %v3085_v23 = vld [vmem:[%s3629_s3 + $0x20] sm:$0xff]  }
 0x13f   : > { %v1102_v45 = vadd.f32 %v1101_v4, %v2921_v59  ;;  %v1171_v30 = vmax.f32 %v1100_v7, 0.0 }
 0x140   : > { %816 = vmatpush1.bf16.msra.mxu1 %v677_v38  ;;  %v1103_v33 = vpop.f32.mrf.mxu0 }
 0x141   : > { %v1172_v12 = vmax.f32 %v1102_v45, 0.0  ;;  %v1104_v13 = vadd.f32 %v1103_v33, %v2921_v59  ;;  %817 = vmatprep.subr.bf16.mxu1 %v676_v61  ;;  %v3063_v45 = vld [vmem:[%s3629_s3 + $0x10] sm:$0xff]  }
 0x142   : > { %v3016_v28 = vpop.f32.mrf.mxu0  ;;  %3647 = vst [vmem:[#allocation5_spill] sm:$0xff] %v3063_v45 }
 0x143   : > { %v3018_v15 = vpack.c.bf16 %v1172_v12, %v1170_v35  ;;  %v1173_v34 = vmax.f32 %v1104_v13, 0.0 }
 0x144   : > { %818 = vmatpush1.bf16.msra.mxu1 %v675_v9  ;;  %v3022_v19 = vpop.f32.mrf.mxu0 }
 0x145   : > { %v3024_v36 = vpack.c.bf16 %v1173_v34, %v1171_v30  ;;  %819 = vmatprep.subr.bf16.mxu1 %v674_v16 }
 0x146   : > { %v3026_v43 = vpop.f32.mrf.mxu0 }
 0x148   : > { %820 = vmatpush1.bf16.msra.mxu1 %v673_v21  ;;  %v3028_v24 = vpop.f32.mrf.mxu0 }
 0x149   : > { %821 = vmatprep.subr.bf16.mxu1 %v672_v22 }
 0x14a   : > { %v3030_v25 = vpop.f32.mrf.mxu0 }
 0x14c   : > { %822 = vmatpush1.bf16.msra.mxu1 %v671_v37  ;;  %v3032_v26 = vpop.f32.mrf.mxu0 }
 0x14d   : > { %823 = vmatprep.subr.bf16.mxu1 %v2951_v31 }
 0x14e   : > { %v3035_v29 = vpop.f32.mrf.mxu0 }
 0x150   : > { %824 = vmatpush1.bf16.msra.mxu1 %v2946_v27  ;;  %v3038_v2 = vpop.f32.mrf.mxu0 }
 0x151   : > { %825 = vmatprep.subr.bf16.mxu1 %v2938_v18  ;;  %v3056_v18 = vld [vmem:[%s3629_s3 + $0x8] sm:$0xff]  }
 0x152   : > { %v3041_v3 = vpop.f32.mrf.mxu0  ;;  %3646 = vst [vmem:[#allocation4_spill] sm:$0xff] %v3056_v18 }
 0x154   : > { %826 = vmatpush1.bf16.msra.mxu1 %v2934_v14  ;;  %v1129_v38 = vpop.f32.mrf.mxu0 }
 0x156   : > { %v3049_v4 = vpop.f32.mrf.mxu0 }
 0x157   : > { %844 = vmatmul.mubr.bf16.vlgmr.msra.gmra.mxu1 %v3046_v1 }
 0x158   : > { %v1133_v31 = vpop.f32.mrf.mxu0  ;;  %853 = vmatprep.mubr.bf16.mxu1 %v3632_v0 }
 0x15a   : > { %v1137_v27 = vpop.f32.mrf.mxu0 }
 0x15c   : > { %v1139_v5 = vpop.f32.mrf.mxu0 }
 0x15e   : > { %v1141_v61 = vpop.f32.mrf.mxu0 }
 0x15f   : > { %854 = vmatmul.mubr.bf16.gmra.mxu1 %v3056_v18 }
 0x160   : > { %v1143_v7 = vpop.f32.mrf.mxu0  ;;  %863 = vmatprep.mubr.bf16.mxu1 %v3632_v0 }
 0x161   : > { %v1144_v20 = vadd.f32 %v1143_v7, %v2899_v50  ;;  %v1134_v7 = vadd.f32 %v1133_v31, %v2905_v52  ;;  %v1138_v31 = vadd.f32 %v1137_v27, %v2897_v49 }
 0x162   : > { %v1147_v14 = vpop.f32.mrf.mxu0 }
 0x163   : > { %v1148_v37 = vadd.f32 %v1147_v14, %v2887_v44 }
 0x164   : > { %v1149_v6 = vpop.f32.mrf.mxu0 }
 0x165   : > { %v1150_v30 = vadd.f32 %v1149_v6, %v2887_v44 }
 0x166   : > { %v1151_v8 = vpop.f32.mrf.mxu0 }
 0x167   : > { %864 = vmatmul.mubr.bf16.gmra.mxu1 %v3063_v45  ;;  %v1152_v16 = vadd.f32 %v1151_v8, %v2893_v48 }
 0x168   : > { %v1153_v62 = vpop.f32.mrf.mxu0  ;;  %873 = vmatprep.mubr.bf16.mxu1 %v3632_v0 }
 0x169   : > { %v1154_v13 = vadd.f32 %v1153_v62, %v2893_v48 }
 0x16a   : > { %v1157_v33 = vpop.f32.mrf.mxu0 }
 0x16b   : > { %v1158_v46 = vadd.f32 %v1157_v33, %v2883_v42  ;;  %v1193_v32 = vmax.f32 %v1154_v13, 0.0  ;;  %v1140_v33 = vadd.f32 %v1139_v5, %v2897_v49  ;;  %v1142_v13 = vadd.f32 %v1141_v61, %v2899_v50 }
 0x16c   : > { %v1159_v35 = vpop.f32.mrf.mxu0  ;;  %v1124_v5 = vadd.f32 %v3038_v2, %v2910_v54  ;;  %v1190_v61 = vmax.f32 %v1148_v37, 0.0 }
 0x16d   : > { %v1160_v55 = vadd.f32 %v1159_v35, %v2883_v42  ;;  %v1194_v62 = vmax.f32 %v1158_v46, 0.0  ;;  %v1191_v35 = vmax.f32 %v1150_v30, 0.0  ;;  %v1130_v46 = vadd.f32 %v1129_v38, %v2902_v51 }
 0x16e   : > { %v1161_v12 = vpop.f32.mrf.mxu0  ;;  %v1188_v2 = vmax.f32 %v1142_v13, 0.0 }
 0x16f   : > { %v1162_v41 = vadd.f32 %v1161_v12, %v2891_v47  ;;  %874 = vmatmul.mubr.bf16.gmra.mxu1 %v3070_v11  ;;  %v1195_v21 = vmax.f32 %v1160_v55, 0.0  ;;  %v1192_v55 = vmax.f32 %v1152_v16, 0.0  ;;  %v3649_v16 = vmov 0  }
 0x170   : > { %v1163_v9 = vpop.f32.mrf.mxu0  ;;  %883 = vmatprep.mubr.bf16.mxu1 %v3632_v0  ;;  %v1211_v0 = vpack.c.bf16 %v1193_v32, %v1191_v35 }
 0x171   : > { %v1164_v34 = vadd.f32 %v1163_v9, %v2891_v47  ;;  %v1196_v17 = vmax.f32 %v1162_v41, 0.0 }
 0x172   : > { %v1491_v10 = vpop.f32.mrf.mxu0 }
 0x173   : > { %v1197_v22 = vmax.f32 %v1164_v34, 0.0  ;;  %v1492_v12 = vadd.f32 %v1491_v10, %v2923_v60  ;;  %v1212_v41 = vpack.c.bf16 %v1196_v17, %v1194_v62  ;;  %v1189_v34 = vmax.f32 %v1144_v20, 0.0 }
 0x174   : > { %v1493_v6 = vpop.f32.mrf.mxu0  ;;  %v1187_v17 = vmax.f32 %v1140_v33, 0.0  ;;  %v1210_v62 = vpack.c.bf16 %v1192_v55, %v1190_v61  ;;  %v3108_v33 = vld [vmem:[%s3629_s3 + $0x28] sm:$0xff]   ;;  %v1114_v55 = vadd.f32 %v3028_v24, %v2915_v57  ;;  %v1118_v24 = vadd.f32 %v3030_v25, %v2907_v53 }
 0x175   : > { %v1213_v8 = vpack.c.bf16 %v1197_v22, %v1195_v21  ;;  %v1494_v11 = vadd.f32 %v1493_v6, %v2923_v60  ;;  %v1570_v10 = vmax.f32 %v1492_v12, 0.0  ;;  %v1132_v21 = vadd.f32 %v3049_v4, %v2905_v52 }
 0x176   : > { %v1495_v9 = vpop.f32.mrf.mxu0  ;;  %v1185_v22 = vmax.f32 %v1134_v7, 0.0  ;;  %v1209_v6 = vpack.c.bf16 %v1189_v34, %v1187_v17  ;;  %v1120_v12 = vadd.f32 %v3032_v26, %v2907_v53  ;;  %v1183_v7 = vmax.f32 %v1130_v46, 0.0 }
 0x177   : > { %v1496_v14 = vadd.f32 %v1495_v9, %v2927_v63  ;;  %884 = vmatmul.mubr.bf16.gmra.mxu1 %v3085_v23  ;;  %1214 = vmatprep.subr.bf16.mxu1 %v1213_v8  ;;  %v1571_v27 = vmax.f32 %v1494_v11, 0.0  ;;  %v1186_v8 = vmax.f32 %v1138_v31, 0.0  ;;  %v1184_v9 = vmax.f32 %v1132_v21, 0.0 }
 0x178   : > { %1215 = vmatpush1.bf16.msra.mxu1 %v1212_v41  ;;  %v1497_v30 = vpop.f32.mrf.mxu0  ;;  %893 = vmatprep.mubr.bf16.mxu1 %v3649_v16  ;;  %v1122_v41 = vadd.f32 %v3035_v29, %v2910_v54  ;;  %v1207_v31 = vpack.c.bf16 %v1185_v22, %v1183_v7  ;;  %v1110_v46 = vadd.f32 %v3022_v19, %v2913_v56  ;;  %v1179_v17 = vmax.f32 %v1120_v12, 0.0 }
 0x179   : > { %v1572_v20 = vmax.f32 %v1496_v14, 0.0  ;;  %v1498_v32 = vadd.f32 %v1497_v30, %v2927_v63  ;;  %1216 = vmatprep.subr.bf16.mxu1 %v1211_v0  ;;  %v1128_v0 = vadd.f32 %v3041_v3, %v2902_v51  ;;  %v1208_v3 = vpack.c.bf16 %v1188_v2, %v1186_v8 }
 0x17a   : > { %v1501_v38 = vpop.f32.mrf.mxu0  ;;  %v1181_v14 = vmax.f32 %v1124_v5, 0.0  ;;  %v1177_v21 = vmax.f32 %v1114_v55, 0.0  ;;  %v1180_v22 = vmax.f32 %v1122_v41, 0.0  ;;  %v1175_v8 = vmax.f32 %v1110_v46, 0.0 }
 0x17b   : > { %v3103_v37 = vpack.c.bf16 %v1572_v20, %v1570_v10  ;;  %v1573_v35 = vmax.f32 %v1498_v32, 0.0  ;;  %v1502_v11 = vadd.f32 %v1501_v38, %v2919_v58  ;;  %v1182_v30 = vmax.f32 %v1128_v0, 0.0 }
 0x17c   : > { %1217 = vmatpush1.bf16.msra.mxu1 %v1210_v62  ;;  %v1503_v4 = vpop.f32.mrf.mxu0  ;;  %v1112_v32 = vadd.f32 %v3026_v43, %v2915_v57  ;;  %v1205_v25 = vpack.c.bf16 %v1181_v14, %v1179_v17  ;;  %v1178_v0 = vmax.f32 %v1118_v24, 0.0  ;;  %v1203_v55 = vpack.c.bf16 %v1177_v21, %v1175_v8 }
 0x17d   : > { %v3114_v13 = vpack.c.bf16 %v1573_v35, %v1571_v27  ;;  %1218 = vmatprep.subr.bf16.mxu1 %v1209_v6  ;;  %v1504_v61 = vadd.f32 %v1503_v4, %v2919_v58  ;;  %v1574_v5 = vmax.f32 %v1502_v11, 0.0  ;;  %v1206_v19 = vpack.c.bf16 %v1184_v9, %v1182_v30  ;;  %v3139_v27 = vld [vmem:[%s3629_s3 + $0x30] sm:$0xff]  }
 0x17e   : > { %v1505_v34 = vpop.f32.mrf.mxu0  ;;  %v1108_v35 = vadd.f32 %v3016_v28, %v2913_v56  ;;  %v1176_v12 = vmax.f32 %v1112_v32, 0.0  ;;  %v1204_v7 = vpack.c.bf16 %v1180_v22, %v1178_v0 }
 0x17f   : > { %v1506_v26 = vadd.f32 %v1505_v34, %v2921_v59  ;;  %894 = vmatmul.mubr.bf16.gmra.mxu1 %v3108_v33  ;;  %v1575_v62 = vmax.f32 %v1504_v61, 0.0  ;;  %v3158_v34 = vld [vmem:[%s3629_s3 + $0x38] sm:$0xff]  }
 0x180   : > { %1219 = vmatpush1.bf16.msra.mxu1 %v1208_v3  ;;  %v1507_v29 = vpop.f32.mrf.mxu0  ;;  %903 = vmatprep.mubr.bf16.mxu1 %v3649_v16  ;;  %v1174_v41 = vmax.f32 %v1108_v35, 0.0 }
 0x181   : > { %v1576_v10 = vmax.f32 %v1506_v26, 0.0  ;;  %v1508_v20 = vadd.f32 %v1507_v29, %v2921_v59  ;;  %1220 = vmatprep.subr.bf16.mxu1 %v1207_v31 }
 0x182   : > { %v3132_v2 = vpop.f32.mrf.mxu0  ;;  %v1202_v28 = vpack.c.bf16 %v1176_v12, %v1174_v41 }
 0x183   : > { %v3134_v38 = vpack.c.bf16 %v1576_v10, %v1574_v5  ;;  %v1577_v6 = vmax.f32 %v1508_v20, 0.0 }
 0x184   : > { %1221 = vmatpush1.bf16.msra.mxu1 %v1206_v19  ;;  %v3143_v43 = vpop.f32.mrf.mxu0 }
 0x185   : > { %v3145_v4 = vpack.c.bf16 %v1577_v6, %v1575_v62  ;;  %1222 = vmatprep.subr.bf16.mxu1 %v1205_v25  ;;  %v3650_v62 = vld [vmem:[#allocation6_spill] sm:$0xff] }
 0x186   : > { %v3147_v11 = vpop.f32.mrf.mxu0 }
 0x187   : > { %904 = vmatmul.mubr.bf16.gmra.mxu1 %v3139_v27 }
 0x188   : > { %1223 = vmatpush1.bf16.msra.mxu1 %v1204_v7  ;;  %v3150_v9 = vpop.f32.mrf.mxu0  ;;  %913 = vmatprep.mubr.bf16.mxu1 %v3649_v16 }
 0x189   : > { %1224 = vmatprep.subr.bf16.mxu1 %v1203_v55 }
 0x18a   : > { %v3153_v3 = vpop.f32.mrf.mxu0 }
 0x18c   : > { %1225 = vmatpush1.bf16.msra.mxu1 %v1202_v28  ;;  %v3160_v14 = vpop.f32.mrf.mxu0 }
 0x18d   : > { %1226 = vmatprep.subr.bf16.mxu1 %v3024_v36 }
 0x18e   : > { %v3163_v31 = vpop.f32.mrf.mxu0 }
 0x18f   : > { %914 = vmatmul.mubr.bf16.gmra.mxu1 %v3158_v34 }
 0x190   : > { %1227 = vmatpush1.bf16.msra.mxu1 %v3018_v15  ;;  %v1527_v61 = vpop.f32.mrf.mxu0  ;;  %1246 = vmatprep.mubr.bf16.mxu1 %v3649_v16 }
 0x191   : > { %1228 = vmatprep.subr.bf16.mxu1 %v3000_v40 }
 0x192   : > { %v3169_v26 = vpop.f32.mrf.mxu0 }
 0x194   : > { %1229 = vmatpush1.bf16.msra.mxu1 %v2994_v39  ;;  %v1533_v46 = vpop.f32.mrf.mxu0 }
 0x196   : > { %v3172_v24 = vpop.f32.mrf.mxu0 }
 0x197   : > { %1247 = vmatmul.mubr.bf16.vlgmr.msra.gmra.mxu1 %v3046_v1 }
 0x198   : > { %v1537_v36 = vpop.f32.mrf.mxu0  ;;  %1256 = vmatprep.mubr.bf16.mxu1 %v3649_v16 }
 0x19a   : > { %v1541_v30 = vpop.f32.mrf.mxu0 }
 0x19c   : > { %v1543_v29 = vpop.f32.mrf.mxu0 }
 0x19e   : > { %v1545_v15 = vpop.f32.mrf.mxu0 }
 0x19f   : > { %1257 = vmatmul.mubr.bf16.gmra.mxu1 %v3056_v18 }
 0x1a0   : > { %v1547_v17 = vpop.f32.mrf.mxu0  ;;  %1266 = vmatprep.mubr.bf16.mxu1 %v3649_v16 }
 0x1a1   : > { %v1548_v41 = vadd.f32 %v1547_v17, %v2899_v50 }
 0x1a2   : > { %v1551_v40 = vpop.f32.mrf.mxu0 }
 0x1a4   : > { %v1553_v5 = vpop.f32.mrf.mxu0 }
 0x1a5   : > { %v1554_v0 = vadd.f32 %v1553_v5, %v2887_v44 }
 0x1a6   : > { %v1555_v10 = vpop.f32.mrf.mxu0 }
 0x1a7   : > { %1267 = vmatmul.mubr.bf16.gmra.mxu1 %v3063_v45  ;;  %v1556_v12 = vadd.f32 %v1555_v10, %v2893_v48  ;;  %v1595_v45 = vmax.f32 %v1554_v0, 0.0  ;;  %v1546_v10 = vadd.f32 %v1545_v15, %v2899_v50 }
 0x1a8   : > { %v1557_v39 = vpop.f32.mrf.mxu0  ;;  %1276 = vmatprep.mubr.bf16.mxu1 %v3649_v16 }
 0x1a9   : > { %v1558_v22 = vadd.f32 %v1557_v39, %v2893_v48 }
 0x1aa   : > { %v1561_v20 = vpop.f32.mrf.mxu0 }
 0x1ab   : > { %v1562_v6 = vadd.f32 %v1561_v20, %v2883_v42  ;;  %v1597_v28 = vmax.f32 %v1558_v22, 0.0  ;;  %v1593_v22 = vmax.f32 %v1548_v41, 0.0 }
 0x1ac   : > { %v1563_v32 = vpop.f32.mrf.mxu0 }
 0x1ad   : > { %v1564_v19 = vadd.f32 %v1563_v32, %v2883_v42  ;;  %v1544_v42 = vadd.f32 %v1543_v29, %v2897_v49  ;;  %v1528_v29 = vadd.f32 %v1527_v61, %v2910_v54  ;;  %v1592_v61 = vmax.f32 %v1546_v10, 0.0 }
 0x1ae   : > { %v1565_v21 = vpop.f32.mrf.mxu0 }
 0x1af   : > { %v1566_v25 = vadd.f32 %v1565_v21, %v2891_v47  ;;  %1277 = vmatmul.mubr.bf16.gmra.mxu1 %v3650_v62  ;;  %v1599_v39 = vmax.f32 %v1564_v19, 0.0  ;;  %v1552_v21 = vadd.f32 %v1551_v40, %v2887_v44  ;;  %v1598_v62 = vmax.f32 %v1562_v6, 0.0 }
 0x1b0   : > { %v1567_v35 = vpop.f32.mrf.mxu0  ;;  %1286 = vmatprep.mubr.bf16.mxu1 %v3649_v16  ;;  %v1615_v19 = vpack.c.bf16 %v1597_v28, %v1595_v45  ;;  %v1534_v6 = vadd.f32 %v1533_v46, %v2902_v51 }
 0x1b1   : > { %v1568_v8 = vadd.f32 %v1567_v35, %v2891_v47  ;;  %v1600_v7 = vmax.f32 %v1566_v25, 0.0  ;;  %v1538_v35 = vadd.f32 %v1537_v36, %v2905_v52  ;;  %v1596_v25 = vmax.f32 %v1556_v12, 0.0 }
 0x1b2   : > { %v1895_v55 = vpop.f32.mrf.mxu0  ;;  %v1542_v36 = vadd.f32 %v1541_v30, %v2897_v49  ;;  %v1594_v0 = vmax.f32 %v1552_v21, 0.0  ;;  %v1587_v21 = vmax.f32 %v1534_v6, 0.0 }
 0x1b3   : > { %v1601_v32 = vmax.f32 %v1568_v8, 0.0  ;;  %v1896_v5 = vadd.f32 %v1895_v55, %v2923_v60  ;;  %v1616_v47 = vpack.c.bf16 %v1600_v7, %v1598_v62  ;;  %v1591_v62 = vmax.f32 %v1544_v42, 0.0 }
 0x1b4   : > { %v1897_v20 = vpop.f32.mrf.mxu0  ;;  %v1589_v7 = vmax.f32 %v1538_v35, 0.0  ;;  %v1614_v55 = vpack.c.bf16 %v1596_v25, %v1594_v0  ;;  %v1532_v42 = vadd.f32 %v3169_v26, %v2902_v51  ;;  %v1526_v35 = vadd.f32 %v3163_v31, %v2910_v54 }
 0x1b5   : > { %v1617_v18 = vpack.c.bf16 %v1601_v32, %v1599_v39  ;;  %v1898_v8 = vadd.f32 %v1897_v20, %v2923_v60  ;;  %v1974_v45 = vmax.f32 %v1896_v5, 0.0  ;;  %v1613_v41 = vpack.c.bf16 %v1593_v22, %v1591_v62 }
 0x1b6   : > { %v1899_v17 = vpop.f32.mrf.mxu0  ;;  %v1590_v39 = vmax.f32 %v1542_v36, 0.0  ;;  %v1518_v5 = vadd.f32 %v3150_v9, %v2915_v57  ;;  %v1611_v22 = vpack.c.bf16 %v1589_v7, %v1587_v21  ;;  %v1522_v9 = vadd.f32 %v3153_v3, %v2907_v53 }
 0x1b7   : > { %v1900_v40 = vadd.f32 %v1899_v17, %v2927_v63  ;;  %1287 = vmatmul.mubr.bf16.gmra.mxu1 %v3085_v23  ;;  %1618 = vmatprep.subr.bf16.mxu1 %v1617_v18  ;;  %v1536_v18 = vadd.f32 %v3172_v24, %v2905_v52  ;;  %v1975_v30 = vmax.f32 %v1898_v8, 0.0  ;;  %v1585_v17 = vmax.f32 %v1528_v29, 0.0 }
 0x1b8   : > { %1619 = vmatpush1.bf16.msra.mxu1 %v1616_v47  ;;  %v1901_v15 = vpop.f32.mrf.mxu0  ;;  %1296 = vmatprep.mubr.bf16.mxu1 %v3649_v16  ;;  %v1612_v26 = vpack.c.bf16 %v1592_v61, %v1590_v39  ;;  %v1514_v8 = vadd.f32 %v3143_v43, %v2913_v56  ;;  %v1516_v0 = vadd.f32 %v3147_v11, %v2915_v57  ;;  %v1584_v62 = vmax.f32 %v1526_v35, 0.0 }
 0x1b9   : > { %v1976_v12 = vmax.f32 %v1900_v40, 0.0  ;;  %v1902_v60 = vadd.f32 %v1901_v15, %v2927_v63  ;;  %1620 = vmatprep.subr.bf16.mxu1 %v1615_v19  ;;  %v1524_v63 = vadd.f32 %v3160_v14, %v2907_v53  ;;  %v1588_v10 = vmax.f32 %v1536_v18, 0.0 }
 0x1ba   : > { %v1905_v46 = vpop.f32.mrf.mxu0  ;;  %v1586_v40 = vmax.f32 %v1532_v42, 0.0  ;;  %v1581_v15 = vmax.f32 %v1518_v5, 0.0  ;;  %v1512_v7 = vadd.f32 %v3132_v2, %v2913_v56  ;;  %v1582_v61 = vmax.f32 %v1522_v9, 0.0 }
 0x1bb   : > { %v3205_v28 = vpack.c.bf16 %v1976_v12, %v1974_v45  ;;  %v1977_v47 = vmax.f32 %v1902_v60, 0.0  ;;  %v1906_v20 = vadd.f32 %v1905_v46, %v2919_v58  ;;  %v1583_v6 = vmax.f32 %v1524_v63, 0.0 }
 0x1bc   : > { %1621 = vmatpush1.bf16.msra.mxu1 %v1614_v55  ;;  %v1907_v32 = vpop.f32.mrf.mxu0  ;;  %v1610_v43 = vpack.c.bf16 %v1588_v10, %v1586_v40  ;;  %v1579_v55 = vmax.f32 %v1514_v8, 0.0  ;;  %v1580_v11 = vmax.f32 %v1516_v0, 0.0  ;;  %v1578_v42 = vmax.f32 %v1512_v7, 0.0  ;;  %v3652_v8 = vld [vmem:[#allocation5_spill] sm:$0xff] }
 0x1bd   : > { %v3211_v24 = vpack.c.bf16 %v1977_v47, %v1975_v30  ;;  %1622 = vmatprep.subr.bf16.mxu1 %v1613_v41  ;;  %v1908_v19 = vadd.f32 %v1907_v32, %v2919_v58  ;;  %v1978_v29 = vmax.f32 %v1906_v20, 0.0  ;;  %v1609_v3 = vpack.c.bf16 %v1585_v17, %v1583_v6  ;;  %v3651_v17 = vld [vmem:[#allocation4_spill] sm:$0xff] }
 0x1be   : > { %v1909_v25 = vpop.f32.mrf.mxu0  ;;  %v1608_v41 = vpack.c.bf16 %v1584_v62, %v1582_v61  ;;  %v1607_v47 = vpack.c.bf16 %v1581_v15, %v1579_v55  ;;  %v1606_v2 = vpack.c.bf16 %v1580_v11, %v1578_v42  ;;  %v3655_v15 = vld [vmem:[#allocation6_spill] sm:$0xff] }
 0x1bf   : > { %v1910_v14 = vadd.f32 %v1909_v25, %v2921_v59  ;;  %1297 = vmatmul.mubr.bf16.gmra.mxu1 %v3108_v33  ;;  %v1979_v12 = vmax.f32 %v1908_v19, 0.0 }
 0x1c0   : > { %1623 = vmatpush1.bf16.msra.mxu1 %v1612_v26  ;;  %v1911_v31 = vpop.f32.mrf.mxu0  ;;  %1306 = vmatprep.mubr.bf16.mxu1 %v3649_v16 }
 0x1c1   : > { %v1980_v36 = vmax.f32 %v1910_v14, 0.0  ;;  %v1912_v58 = vadd.f32 %v1911_v31, %v2921_v59  ;;  %1624 = vmatprep.subr.bf16.mxu1 %v1611_v22 }
 0x1c2   : > { %v3229_v45 = vpop.f32.mrf.mxu0 }
 0x1c3   : > { %v3231_v60 = vpack.c.bf16 %v1980_v36, %v1978_v29  ;;  %v1981_v18 = vmax.f32 %v1912_v58, 0.0  ;;  %v3653_v29 = vld [vmem:[#allocation2_spill] sm:$0xff]  ;;  %v3654_v58 = vld [vmem:[#allocation3_spill] sm:$0xff] }
 0x1c4   : > { %1625 = vmatpush1.bf16.msra.mxu1 %v1610_v43  ;;  %v3235_v59 = vpop.f32.mrf.mxu0 }
 0x1c5   : > { %v3237_v46 = vpack.c.bf16 %v1981_v18, %v1979_v12  ;;  %1626 = vmatprep.subr.bf16.mxu1 %v1609_v3 }
 0x1c6   : > { %v3239_v30 = vpop.f32.mrf.mxu0 }
 0x1c7   : > { %1307 = vmatmul.mubr.bf16.gmra.mxu1 %v3139_v27 }
 0x1c8   : > { %1627 = vmatpush1.bf16.msra.mxu1 %v1608_v41  ;;  %v3242_v39 = vpop.f32.mrf.mxu0  ;;  %1316 = vmatprep.mubr.bf16.mxu1 %v3649_v16 }
 0x1c9   : > { %1628 = vmatprep.subr.bf16.mxu1 %v1607_v47 }
 0x1ca   : > { %v3245_v32 = vpop.f32.mrf.mxu0 }
 0x1cc   : > { %1629 = vmatpush1.bf16.msra.mxu1 %v1606_v2  ;;  %v3247_v63 = vpop.f32.mrf.mxu0 }
 0x1cd   : > { %1630 = vmatprep.subr.bf16.mxu1 %v3145_v4 }
 0x1ce   : > { %v3250_v21 = vpop.f32.mrf.mxu0 }
 0x1cf   : > { %1317 = vmatmul.mubr.bf16.gmra.mxu1 %v3158_v34 }
 0x1d0   : > { %1631 = vmatpush1.bf16.msra.mxu1 %v3134_v38  ;;  %v3254_v20 = vpop.f32.mrf.mxu0  ;;  %1650 = vmatprep.mubr.bf16.mxu1 %v3649_v16 }
 0x1d1   : > { %1632 = vmatprep.subr.bf16.mxu1 %v3114_v13 }
 0x1d2   : > { %v3258_v5 = vpop.f32.mrf.mxu0 }
 0x1d4   : > { %1633 = vmatpush1.bf16.msra.mxu1 %v3103_v37  ;;  %v1937_v35 = vpop.f32.mrf.mxu0 }
 0x1d6   : > { %v1939_v10 = vpop.f32.mrf.mxu0 }
 0x1d7   : > { %1651 = vmatmul.mubr.bf16.vlgmr.msra.gmra.mxu1 %v3046_v1 }
 0x1d8   : > { %v1941_v4 = vpop.f32.mrf.mxu0  ;;  %1660 = vmatprep.mubr.bf16.mxu1 %v3649_v16 }
 0x1da   : > { %v1945_v26 = vpop.f32.mrf.mxu0 }
 0x1dc   : > { %v1947_v25 = vpop.f32.mrf.mxu0 }
 0x1dd   : > { %v1948_v2 = vadd.f32 %v1947_v25, %v2897_v49 }
 0x1de   : > { %v1949_v38 = vpop.f32.mrf.mxu0 }
 0x1df   : > { %1661 = vmatmul.mubr.bf16.gmra.mxu1 %v3651_v17  ;;  %v1995_v25 = vmax.f32 %v1948_v2, 0.0 }
 0x1e0   : > { %v1951_v22 = vpop.f32.mrf.mxu0  ;;  %1670 = vmatprep.mubr.bf16.mxu1 %v3649_v16 }
 0x1e1   : > { %v1952_v61 = vadd.f32 %v1951_v22, %v2899_v50  ;;  %v1946_v22 = vadd.f32 %v1945_v26, %v2897_v49  ;;  %v1936_v49 = vadd.f32 %v3258_v5, %v2902_v51 }
 0x1e2   : > { %v1955_v13 = vpop.f32.mrf.mxu0 }
 0x1e3   : > { %v1956_v47 = vadd.f32 %v1955_v13, %v2887_v44  ;;  %v1994_v26 = vmax.f32 %v1946_v22, 0.0  ;;  %v1990_v5 = vmax.f32 %v1936_v49, 0.0 }
 0x1e4   : > { %v1957_v19 = vpop.f32.mrf.mxu0 }
 0x1e5   : > { %v1958_v3 = vadd.f32 %v1957_v19, %v2887_v44  ;;  %v1938_v44 = vadd.f32 %v1937_v35, %v2902_v51  ;;  %v1926_v51 = vadd.f32 %v3245_v32, %v2907_v53 }
 0x1e6   : > { %v1959_v14 = vpop.f32.mrf.mxu0 }
 0x1e7   : > { %1671 = vmatmul.mubr.bf16.gmra.mxu1 %v3652_v8  ;;  %v1960_v18 = vadd.f32 %v1959_v14, %v2893_v48  ;;  %v1991_v35 = vmax.f32 %v1938_v44, 0.0 }
 0x1e8   : > { %v1961_v37 = vpop.f32.mrf.mxu0  ;;  %1680 = vmatprep.mubr.bf16.mxu1 %v3649_v16 }
 0x1e9   : > { %v1962_v6 = vadd.f32 %v1961_v37, %v2893_v48  ;;  %v1999_v37 = vmax.f32 %v1958_v3, 0.0  ;;  %v2000_v19 = vmax.f32 %v1960_v18, 0.0  ;;  %v1997_v48 = vmax.f32 %v1952_v61, 0.0 }
 0x1ea   : > { %v1965_v9 = vpop.f32.mrf.mxu0  ;;  %v1916_v61 = vadd.f32 %v3229_v45, %v2913_v56 }
 0x1eb   : > { %v1966_v62 = vadd.f32 %v1965_v9, %v3653_v29  ;;  %v2001_v55 = vmax.f32 %v1962_v6, 0.0  ;;  %v1998_v6 = vmax.f32 %v1956_v47, 0.0 }
 0x1ec   : > { %v1967_v40 = vpop.f32.mrf.mxu0 }
 0x1ed   : > { %v1968_v36 = vadd.f32 %v1967_v40, %v3653_v29  ;;  %v2002_v42 = vmax.f32 %v1966_v62, 0.0  ;;  %v1950_v40 = vadd.f32 %v1949_v38, %v2899_v50  ;;  %v1942_v29 = vadd.f32 %v1941_v4, %v2905_v52 }
 0x1ee   : > { %v1969_v31 = vpop.f32.mrf.mxu0  ;;  %v2019_v14 = vpack.c.bf16 %v2001_v55, %v1999_v37  ;;  %v1940_v50 = vadd.f32 %v1939_v10, %v2905_v52  ;;  %v2018_v13 = vpack.c.bf16 %v2000_v19, %v1998_v6  ;;  %v1932_v4 = vadd.f32 %v3254_v20, %v2910_v54 }
 0x1ef   : > { %v1970_v0 = vadd.f32 %v1969_v31, %v3654_v58  ;;  %1681 = vmatmul.mubr.bf16.gmra.mxu1 %v3655_v15  ;;  %v2003_v11 = vmax.f32 %v1968_v36, 0.0  ;;  %v1996_v38 = vmax.f32 %v1950_v40, 0.0  ;;  %v1993_v36 = vmax.f32 %v1942_v29, 0.0 }
 0x1f0   : > { %v1971_v43 = vpop.f32.mrf.mxu0  ;;  %1690 = vmatprep.mubr.bf16.mxu1 %v3649_v16  ;;  %v1930_v52 = vadd.f32 %v3250_v21, %v2910_v54  ;;  %v1992_v10 = vmax.f32 %v1940_v50, 0.0  ;;  %v1922_v20 = vadd.f32 %v3242_v39, %v2915_v57  ;;  %v1920_v21 = vadd.f32 %v3239_v30, %v2915_v57 }
 0x1f1   : > { %v1972_v12 = vadd.f32 %v1971_v43, %v3654_v58  ;;  %v2004_v7 = vmax.f32 %v1970_v0, 0.0  ;;  %v2017_v58 = vpack.c.bf16 %v1997_v48, %v1995_v25  ;;  %v1928_v0 = vadd.f32 %v3247_v63, %v2907_v53 }
 0x1f2   : > { %v2016_v62 = vpack.c.bf16 %v1996_v38, %v1994_v26  ;;  %v1989_v43 = vmax.f32 %v1932_v4, 0.0  ;;  %v2015_v3 = vpack.c.bf16 %v1993_v36, %v1991_v35  ;;  %v1918_v63 = vadd.f32 %v3235_v59, %v2913_v56  ;;  %v3315_v56 = vpop.permute.xlu0 %685 }
 0x1f3   : > { %v2005_v41 = vmax.f32 %v1972_v12, 0.0  ;;  %v2020_v31 = vpack.c.bf16 %v2004_v7, %v2002_v42  ;;  %v1987_v54 = vmax.f32 %v1928_v0, 0.0  ;;  %v1988_v39 = vmax.f32 %v1930_v52, 0.0 }
 0x1f4   : > { %v2014_v12 = vpack.c.bf16 %v1992_v10, %v1990_v5  ;;  %v1985_v18 = vmax.f32 %v1922_v20, 0.0  ;;  %v1986_v53 = vmax.f32 %v1926_v51, 0.0  ;;  %v1983_v32 = vmax.f32 %v1918_v63, 0.0 }
 0x1f5   : > { %v2021_v9 = vpack.c.bf16 %v2005_v41, %v2003_v11  ;;  %v2013_v7 = vpack.c.bf16 %v1989_v43, %v1987_v54  ;;  %v1984_v55 = vmax.f32 %v1920_v21, 0.0  ;;  %v1982_v41 = vmax.f32 %v1916_v61, 0.0 }
 0x1f6   : > { %v2012_v11 = vpack.c.bf16 %v1988_v39, %v1986_v53  ;;  %v2011_v59 = vpack.c.bf16 %v1985_v18, %v1983_v32  ;;  %v3333_v2 = vpop.permute.xlu0 %695 }
 0x1f7   : > { %1691 = vmatmul.mubr.bf16.gmra.mxu1 %v3085_v23  ;;  %2022 = vmatprep.subr.bf16.mxu1 %v2021_v9  ;;  %v2010_v57 = vpack.c.bf16 %v1984_v55, %v1982_v41 }
 0x1f8   : > { %2023 = vmatpush1.bf16.msra.mxu1 %v2020_v31  ;;  %1700 = vmatprep.mubr.bf16.mxu1 %v3649_v16 }
 0x1f9   : > { %2024 = vmatprep.subr.bf16.mxu1 %v2019_v14 }
 0x1fa   : > { %v3347_v22 = vpop.permute.xlu0 %705 }
 0x1fc   : > { %2025 = vmatpush1.bf16.msra.mxu1 %v2018_v13 }
 0x1fd   : > { %2026 = vmatprep.subr.bf16.mxu1 %v2017_v58 }
 0x1fe   : > { %v3361_v58 = vpop.permute.xlu0 %715 }
 0x1ff   : > { %1701 = vmatmul.mubr.bf16.gmra.mxu1 %v3108_v33 }
 0x200   : > { %2027 = vmatpush1.bf16.msra.mxu1 %v2016_v62  ;;  %1710 = vmatprep.mubr.bf16.mxu1 %v3649_v16 }
 0x201   : > { %2028 = vmatprep.subr.bf16.mxu1 %v2015_v3 }
 0x202   : > { %v3375_v43 = vpop.permute.xlu0 %725 }
 0x204   : > { %2029 = vmatpush1.bf16.msra.mxu1 %v2014_v12 }
 0x205   : > { %2030 = vmatprep.subr.bf16.mxu1 %v2013_v7 }
 0x206   : > { %v3389_v18 = vpop.permute.xlu0 %735 }
 0x207   : > { %1711 = vmatmul.mubr.bf16.gmra.mxu1 %v3139_v27 }
 0x208   : > { %2031 = vmatpush1.bf16.msra.mxu1 %v2012_v11  ;;  %1720 = vmatprep.mubr.bf16.mxu1 %v3649_v16 }
 0x209   : > { %2032 = vmatprep.subr.bf16.mxu1 %v2011_v59 }
 0x20c   : > { %2033 = vmatpush1.bf16.msra.mxu1 %v2010_v57  ;;  %v3403_v57 = vpop.permute.xlu0 %745 }
 0x20d   : > { %2034 = vmatprep.subr.bf16.mxu1 %v3237_v46  ;;  %v3327_v46 = vpop.permute.xlu1 %690 }
 0x20f   : > { %1721 = vmatmul.mubr.bf16.gmra.mxu1 %v3158_v34 }
 0x210   : > { %2035 = vmatpush1.bf16.msra.mxu1 %v3231_v60  ;;  %2054 = vmatprep.mubr.bf16.mxu1 %v3649_v16 }
 0x211   : > { %2036 = vmatprep.subr.bf16.mxu1 %v3211_v24  ;;  %v3341_v31 = vpop.permute.xlu1 %700 }
 0x214   : > { %2037 = vmatpush1.bf16.msra.mxu1 %v3205_v28 }
 0x215   : > { %v3355_v38 = vpop.permute.xlu1 %710 }
 0x217   : > { %v845_v45 = vpop.f32.mrf.mxu1  ;;  %2055 = vmatmul.mubr.bf16.vlgmr.msra.gmra.mxu1 %v3046_v1 }
 0x218   : > { %v846_v60 = vadd.f32 %v845_v45, %v3315_v56  ;;  %2064 = vmatprep.mubr.bf16.mxu1 %v3649_v16 }
 0x219   : > { %v847_v28 = vpop.f32.mrf.mxu1  ;;  %v3369_v52 = vpop.permute.xlu1 %720 }
 0x21a   : > { %924 = vst [vmem:[%s3320_s10] sm:$0xff] %v846_v60  ;;  %v848_v24 = vadd.f32 %v847_v28, %v3315_v56 }
 0x21b   : > { %v849_v30 = vpop.f32.mrf.mxu1 }
 0x21c   : > { %925 = vst [vmem:[%s3320_s10 + $0x8] sm:$0xff] %v848_v24  ;;  %v850_v47 = vadd.f32 %v849_v30, %v3327_v46 }
 0x21d   : > { %v851_v42 = vpop.f32.mrf.mxu1  ;;  %v3383_v54 = vpop.permute.xlu1 %730 }
 0x21e   : > { %926 = vst [vmem:[%s3320_s10 + $0x10] sm:$0xff] %v850_v47  ;;  %v852_v1 = vadd.f32 %v851_v42, %v3327_v46 }
 0x21f   : > { %v855_v37 = vpop.f32.mrf.mxu1  ;;  %2065 = vmatmul.mubr.bf16.gmra.mxu1 %v3651_v17 }
 0x220   : > { %927 = vst [vmem:[%s3320_s10 + $0x18] sm:$0xff] %v852_v1  ;;  %v856_v9 = vadd.f32 %v855_v37, %v3333_v2  ;;  %2074 = vmatprep.mubr.bf16.mxu1 %v3649_v16  ;;  %v3417_v37 = vpop.permute.xlu0 %755 }
 0x221   : > { %v857_v40 = vpop.f32.mrf.mxu1  ;;  %v3397_v55 = vpop.permute.xlu1 %740 }
 0x222   : > { %928 = vst [vmem:[%s3320_s10 + $0x20] sm:$0xff] %v856_v9  ;;  %v858_v19 = vadd.f32 %v857_v40, %v3333_v2 }
 0x223   : > { %v859_v29 = vpop.f32.mrf.mxu1 }
 0x224   : > { %929 = vst [vmem:[%s3320_s10 + $0x28] sm:$0xff] %v858_v19  ;;  %v860_v48 = vadd.f32 %v859_v29, %v3341_v31 }
 0x225   : > { %v861_v14 = vpop.f32.mrf.mxu1  ;;  %v3411_v30 = vpop.permute.xlu1 %750 }
 0x226   : > { %930 = vst [vmem:[%s3320_s10 + $0x30] sm:$0xff] %v860_v48  ;;  %v862_v17 = vadd.f32 %v861_v14, %v3341_v31 }
 0x227   : > { %v865_v6 = vpop.f32.mrf.mxu1  ;;  %2075 = vmatmul.mubr.bf16.gmra.mxu1 %v3652_v8 }
 0x228   : > { %931 = vst [vmem:[%s3320_s10 + $0x38] sm:$0xff] %v862_v17  ;;  %v866_v44 = vadd.f32 %v865_v6, %v3347_v22  ;;  %2084 = vmatprep.mubr.bf16.mxu1 %v3649_v16 }
 0x229   : > { %v867_v25 = vpop.f32.mrf.mxu1  ;;  %v3424_v29 = vpop.permute.xlu1 %760 }
 0x22a   : > { %932 = vst [vmem:[%s3320_s10 + $0x40] sm:$0xff] %v866_v44  ;;  %v868_v50 = vadd.f32 %v867_v25, %v3347_v22 }
 0x22b   : > { %v869_v13 = vpop.f32.mrf.mxu1 }
 0x22c   : > { %933 = vst [vmem:[%s3320_s10 + $0x48] sm:$0xff] %v868_v50  ;;  %v870_v4 = vadd.f32 %v869_v13, %v3355_v38 }
 0x22d   : > { %v871_v36 = vpop.f32.mrf.mxu1 }
 0x22e   : > { %934 = vst [vmem:[%s3320_s10 + $0x50] sm:$0xff] %v870_v4  ;;  %v872_v8 = vadd.f32 %v871_v36, %v3355_v38 }
 0x22f   : > { %v875_v49 = vpop.f32.mrf.mxu1  ;;  %2085 = vmatmul.mubr.bf16.gmra.mxu1 %v3655_v15 }
 0x230   : > { %935 = vst [vmem:[%s3320_s10 + $0x58] sm:$0xff] %v872_v8  ;;  %v876_v26 = vadd.f32 %v875_v49, %v3361_v58  ;;  %2094 = vmatprep.mubr.bf16.mxu1 %v3649_v16 }
 0x231   : > { %v877_v0 = vpop.f32.mrf.mxu1 }
 0x232   : > { %936 = vst [vmem:[%s3320_s10 + $0x60] sm:$0xff] %v876_v26  ;;  %v878_v35 = vadd.f32 %v877_v0, %v3361_v58 }
 0x233   : > { %v879_v10 = vpop.f32.mrf.mxu1 }
 0x234   : > { %937 = vst [vmem:[%s3320_s10 + $0x68] sm:$0xff] %v878_v35  ;;  %v880_v62 = vadd.f32 %v879_v10, %v3369_v52 }
 0x235   : > { %v881_v20 = vpop.f32.mrf.mxu1 }
 0x236   : > { %938 = vst [vmem:[%s3320_s10 + $0x70] sm:$0xff] %v880_v62  ;;  %v882_v15 = vadd.f32 %v881_v20, %v3369_v52 }
 0x237   : > { %v885_v3 = vpop.f32.mrf.mxu1  ;;  %2095 = vmatmul.mubr.bf16.gmra.mxu1 %v3085_v23 }
 0x238   : > { %939 = vst [vmem:[%s3320_s10 + $0x78] sm:$0xff] %v882_v15  ;;  %v886_v51 = vadd.f32 %v885_v3, %v3375_v43  ;;  %2104 = vmatprep.mubr.bf16.mxu1 %v3649_v16 }
 0x239   : > { %v887_v5 = vpop.f32.mrf.mxu1 }
 0x23a   : > { %940 = vst [vmem:[%s3320_s10 + $0x80] sm:$0xff] %v886_v51  ;;  %v888_v63 = vadd.f32 %v887_v5, %v3375_v43 }
 0x23b   : > { %v889_v21 = vpop.f32.mrf.mxu1 }
 0x23c   : > { %941 = vst [vmem:[%s3320_s10 + $0x88] sm:$0xff] %v888_v63  ;;  %v890_v39 = vadd.f32 %v889_v21, %v3383_v54 }
 0x23d   : > { %v891_v12 = vpop.f32.mrf.mxu1 }
 0x23e   : > { %942 = vst [vmem:[%s3320_s10 + $0x90] sm:$0xff] %v890_v39  ;;  %v892_v23 = vadd.f32 %v891_v12, %v3383_v54 }
 0x23f   : > { %v895_v7 = vpop.f32.mrf.mxu1  ;;  %2105 = vmatmul.mubr.bf16.gmra.mxu1 %v3108_v33 }
 0x240   : > { %943 = vst [vmem:[%s3320_s10 + $0x98] sm:$0xff] %v892_v23  ;;  %v896_v61 = vadd.f32 %v895_v7, %v3389_v18  ;;  %2114 = vmatprep.mubr.bf16.mxu1 %v3649_v16 }
 0x241   : > { %v897_v53 = vpop.f32.mrf.mxu1 }
 0x242   : > { %944 = vst [vmem:[%s3320_s10 + $0xa0] sm:$0xff] %v896_v61  ;;  %v898_v32 = vadd.f32 %v897_v53, %v3389_v18 }
 0x243   : > { %v899_v11 = vpop.f32.mrf.mxu1 }
 0x244   : > { %945 = vst [vmem:[%s3320_s10 + $0xa8] sm:$0xff] %v898_v32  ;;  %v900_v59 = vadd.f32 %v899_v11, %v3397_v55 }
 0x245   : > { %v901_v41 = vpop.f32.mrf.mxu1 }
 0x246   : > { %946 = vst [vmem:[%s3320_s10 + $0xb0] sm:$0xff] %v900_v59  ;;  %v902_v33 = vadd.f32 %v901_v41, %v3397_v55 }
 0x247   : > { %v905_v45 = vpop.f32.mrf.mxu1  ;;  %2115 = vmatmul.mubr.bf16.gmra.mxu1 %v3139_v27 }
 0x248   : > { %947 = vst [vmem:[%s3320_s10 + $0xb8] sm:$0xff] %v902_v33  ;;  %v906_v60 = vadd.f32 %v905_v45, %v3403_v57  ;;  %2124 = vmatprep.mubr.bf16.mxu1 %v3649_v16 }
 0x249   : > { %v907_v28 = vpop.f32.mrf.mxu1 }
 0x24a   : > { %948 = vst [vmem:[%s3320_s10 + $0xc0] sm:$0xff] %v906_v60  ;;  %v908_v24 = vadd.f32 %v907_v28, %v3403_v57 }
 0x24b   : > { %v909_v47 = vpop.f32.mrf.mxu1 }
 0x24c   : > { %949 = vst [vmem:[%s3320_s10 + $0xc8] sm:$0xff] %v908_v24  ;;  %v910_v42 = vadd.f32 %v909_v47, %v3411_v30 }
 0x24d   : > { %v911_v1 = vpop.f32.mrf.mxu1 }
 0x24e   : > { %950 = vst [vmem:[%s3320_s10 + $0xd0] sm:$0xff] %v910_v42  ;;  %v912_v27 = vadd.f32 %v911_v1, %v3411_v30 }
 0x24f   : > { %v915_v16 = vpop.f32.mrf.mxu1  ;;  %2125 = vmatmul.mubr.bf16.gmra.mxu1 %v3158_v34 }
 0x250   : > { %951 = vst [vmem:[%s3320_s10 + $0xd8] sm:$0xff] %v912_v27  ;;  %v916_v9 = vadd.f32 %v915_v16, %v3417_v37 }
 0x251   : > { %v917_v40 = vpop.f32.mrf.mxu1 }
 0x252   : > { %952 = vst [vmem:[%s3320_s10 + $0xe0] sm:$0xff] %v916_v9  ;;  %v918_v19 = vadd.f32 %v917_v40, %v3417_v37 }
 0x253   : > { %v919_v48 = vpop.f32.mrf.mxu1 }
 0x254   : > { %953 = vst [vmem:[%s3320_s10 + $0xe8] sm:$0xff] %v918_v19  ;;  %v920_v14 = vadd.f32 %v919_v48, %v3424_v29 }
 0x255   : > { %v921_v17 = vpop.f32.mrf.mxu1 }
 0x256   : > { %954 = vst [vmem:[%s3320_s10 + $0xf0] sm:$0xff] %v920_v14  ;;  %v922_v34 = vadd.f32 %v921_v17, %v3424_v29 }
 0x257   : > { %v1248_v6 = vpop.f32.mrf.mxu1 }
 0x258   : > { %955 = vst [vmem:[%s3320_s10 + $0xf8] sm:$0xff] %v922_v34  ;;  %v1249_v44 = vadd.f32 %v1248_v6, %v3315_v56 }
 0x259   : > { %v1250_v25 = vpop.f32.mrf.mxu1 }
 0x25a   : > { %2301 = vst [vmem:[%s3320_s10 + $0x100] sm:$0xff] %v1249_v44  ;;  %v1251_v50 = vadd.f32 %v1250_v25, %v3315_v56 }
 0x25b   : > { %v1252_v13 = vpop.f32.mrf.mxu1 }
 0x25c   : > { %2302 = vst [vmem:[%s3320_s10 + $0x108] sm:$0xff] %v1251_v50  ;;  %v1253_v4 = vadd.f32 %v1252_v13, %v3327_v46 }
 0x25d   : > { %v1254_v36 = vpop.f32.mrf.mxu1 }
 0x25e   : > { %2303 = vst [vmem:[%s3320_s10 + $0x110] sm:$0xff] %v1253_v4  ;;  %v1255_v8 = vadd.f32 %v1254_v36, %v3327_v46 }
 0x25f   : > { %v1258_v49 = vpop.f32.mrf.mxu1 }
 0x260   : > { %2304 = vst [vmem:[%s3320_s10 + $0x118] sm:$0xff] %v1255_v8  ;;  %v1259_v26 = vadd.f32 %v1258_v49, %v3333_v2 }
 0x261   : > { %v1260_v0 = vpop.f32.mrf.mxu1 }
 0x262   : > { %2305 = vst [vmem:[%s3320_s10 + $0x120] sm:$0xff] %v1259_v26  ;;  %v1261_v35 = vadd.f32 %v1260_v0, %v3333_v2 }
 0x263   : > { %v1262_v10 = vpop.f32.mrf.mxu1 }
 0x264   : > { %2306 = vst [vmem:[%s3320_s10 + $0x128] sm:$0xff] %v1261_v35  ;;  %v1263_v62 = vadd.f32 %v1262_v10, %v3341_v31 }
 0x265   : > { %v1264_v20 = vpop.f32.mrf.mxu1 }
 0x266   : > { %2307 = vst [vmem:[%s3320_s10 + $0x130] sm:$0xff] %v1263_v62  ;;  %v1265_v15 = vadd.f32 %v1264_v20, %v3341_v31 }
 0x267   : > { %v1268_v3 = vpop.f32.mrf.mxu1 }
 0x268   : > { %2308 = vst [vmem:[%s3320_s10 + $0x138] sm:$0xff] %v1265_v15  ;;  %v1269_v51 = vadd.f32 %v1268_v3, %v3347_v22 }
 0x269   : > { %v1270_v5 = vpop.f32.mrf.mxu1 }
 0x26a   : > { %2309 = vst [vmem:[%s3320_s10 + $0x140] sm:$0xff] %v1269_v51  ;;  %v1271_v63 = vadd.f32 %v1270_v5, %v3347_v22 }
 0x26b   : > { %v1272_v21 = vpop.f32.mrf.mxu1 }
 0x26c   : > { %2310 = vst [vmem:[%s3320_s10 + $0x148] sm:$0xff] %v1271_v63  ;;  %v1273_v39 = vadd.f32 %v1272_v21, %v3355_v38 }
 0x26d   : > { %v1274_v12 = vpop.f32.mrf.mxu1 }
 0x26e   : > { %2311 = vst [vmem:[%s3320_s10 + $0x150] sm:$0xff] %v1273_v39  ;;  %v1275_v23 = vadd.f32 %v1274_v12, %v3355_v38 }
 0x26f   : > { %v1278_v7 = vpop.f32.mrf.mxu1 }
 0x270   : > { %2312 = vst [vmem:[%s3320_s10 + $0x158] sm:$0xff] %v1275_v23  ;;  %v1279_v61 = vadd.f32 %v1278_v7, %v3361_v58 }
 0x271   : > { %v1280_v53 = vpop.f32.mrf.mxu1 }
 0x272   : > { %2313 = vst [vmem:[%s3320_s10 + $0x160] sm:$0xff] %v1279_v61  ;;  %v1281_v32 = vadd.f32 %v1280_v53, %v3361_v58 }
 0x273   : > { %v1282_v11 = vpop.f32.mrf.mxu1 }
 0x274   : > { %2314 = vst [vmem:[%s3320_s10 + $0x168] sm:$0xff] %v1281_v32  ;;  %v1283_v59 = vadd.f32 %v1282_v11, %v3369_v52 }
 0x275   : > { %v1284_v41 = vpop.f32.mrf.mxu1 }
 0x276   : > { %2315 = vst [vmem:[%s3320_s10 + $0x170] sm:$0xff] %v1283_v59  ;;  %v1285_v33 = vadd.f32 %v1284_v41, %v3369_v52 }
 0x277   : > { %v1288_v45 = vpop.f32.mrf.mxu1 }
 0x278   : > { %2316 = vst [vmem:[%s3320_s10 + $0x178] sm:$0xff] %v1285_v33  ;;  %v1289_v60 = vadd.f32 %v1288_v45, %v3375_v43 }
 0x279   : > { %v1290_v28 = vpop.f32.mrf.mxu1 }
 0x27a   : > { %2317 = vst [vmem:[%s3320_s10 + $0x180] sm:$0xff] %v1289_v60  ;;  %v1291_v24 = vadd.f32 %v1290_v28, %v3375_v43 }
 0x27b   : > { %v1292_v47 = vpop.f32.mrf.mxu1 }
 0x27c   : > { %2318 = vst [vmem:[%s3320_s10 + $0x188] sm:$0xff] %v1291_v24  ;;  %v1293_v42 = vadd.f32 %v1292_v47, %v3383_v54 }
 0x27d   : > { %v1294_v1 = vpop.f32.mrf.mxu1 }
 0x27e   : > { %2319 = vst [vmem:[%s3320_s10 + $0x190] sm:$0xff] %v1293_v42  ;;  %v1295_v27 = vadd.f32 %v1294_v1, %v3383_v54 }
 0x27f   : > { %v1298_v16 = vpop.f32.mrf.mxu1 }
 0x280   : > { %2320 = vst [vmem:[%s3320_s10 + $0x198] sm:$0xff] %v1295_v27  ;;  %v1299_v9 = vadd.f32 %v1298_v16, %v3389_v18 }
 0x281   : > { %v1300_v40 = vpop.f32.mrf.mxu1 }
 0x282   : > { %2321 = vst [vmem:[%s3320_s10 + $0x1a0] sm:$0xff] %v1299_v9  ;;  %v1301_v19 = vadd.f32 %v1300_v40, %v3389_v18 }
 0x283   : > { %v1302_v48 = vpop.f32.mrf.mxu1 }
 0x284   : > { %2322 = vst [vmem:[%s3320_s10 + $0x1a8] sm:$0xff] %v1301_v19  ;;  %v1303_v14 = vadd.f32 %v1302_v48, %v3397_v55 }
 0x285   : > { %v1304_v17 = vpop.f32.mrf.mxu1 }
 0x286   : > { %2323 = vst [vmem:[%s3320_s10 + $0x1b0] sm:$0xff] %v1303_v14  ;;  %v1305_v34 = vadd.f32 %v1304_v17, %v3397_v55 }
 0x287   : > { %v1308_v6 = vpop.f32.mrf.mxu1 }
 0x288   : > { %2324 = vst [vmem:[%s3320_s10 + $0x1b8] sm:$0xff] %v1305_v34  ;;  %v1309_v44 = vadd.f32 %v1308_v6, %v3403_v57 }
 0x289   : > { %v1310_v25 = vpop.f32.mrf.mxu1 }
 0x28a   : > { %2325 = vst [vmem:[%s3320_s10 + $0x1c0] sm:$0xff] %v1309_v44  ;;  %v1311_v50 = vadd.f32 %v1310_v25, %v3403_v57 }
 0x28b   : > { %v1312_v13 = vpop.f32.mrf.mxu1 }
 0x28c   : > { %2326 = vst [vmem:[%s3320_s10 + $0x1c8] sm:$0xff] %v1311_v50  ;;  %v1313_v4 = vadd.f32 %v1312_v13, %v3411_v30 }
 0x28d   : > { %v1314_v36 = vpop.f32.mrf.mxu1 }
 0x28e   : > { %2327 = vst [vmem:[%s3320_s10 + $0x1d0] sm:$0xff] %v1313_v4  ;;  %v1315_v8 = vadd.f32 %v1314_v36, %v3411_v30 }
 0x28f   : > { %v1318_v49 = vpop.f32.mrf.mxu1 }
 0x290   : > { %2328 = vst [vmem:[%s3320_s10 + $0x1d8] sm:$0xff] %v1315_v8  ;;  %v1319_v26 = vadd.f32 %v1318_v49, %v3417_v37 }
 0x291   : > { %v1320_v0 = vpop.f32.mrf.mxu1 }
 0x292   : > { %2329 = vst [vmem:[%s3320_s10 + $0x1e0] sm:$0xff] %v1319_v26  ;;  %v1321_v35 = vadd.f32 %v1320_v0, %v3417_v37 }
 0x293   : > { %v1322_v10 = vpop.f32.mrf.mxu1 }
 0x294   : > { %2330 = vst [vmem:[%s3320_s10 + $0x1e8] sm:$0xff] %v1321_v35  ;;  %v1323_v62 = vadd.f32 %v1322_v10, %v3424_v29 }
 0x295   : > { %v1324_v20 = vpop.f32.mrf.mxu1 }
 0x296   : > { %2331 = vst [vmem:[%s3320_s10 + $0x1f0] sm:$0xff] %v1323_v62  ;;  %v1325_v15 = vadd.f32 %v1324_v20, %v3424_v29 }
 0x297   : > { %v1652_v3 = vpop.f32.mrf.mxu1 }
 0x298   : > { %2332 = vst [vmem:[%s3320_s10 + $0x1f8] sm:$0xff] %v1325_v15  ;;  %v1653_v51 = vadd.f32 %v1652_v3, %v3315_v56 }
 0x299   : > { %v1654_v5 = vpop.f32.mrf.mxu1 }
 0x29a   : > { %2365 = vst [vmem:[%s3320_s10 + $0x200] sm:$0xff] %v1653_v51  ;;  %v1655_v63 = vadd.f32 %v1654_v5, %v3315_v56 }
 0x29b   : > { %v1656_v21 = vpop.f32.mrf.mxu1 }
 0x29c   : > { %2366 = vst [vmem:[%s3320_s10 + $0x208] sm:$0xff] %v1655_v63  ;;  %v1657_v39 = vadd.f32 %v1656_v21, %v3327_v46 }
 0x29d   : > { %v1658_v12 = vpop.f32.mrf.mxu1 }
 0x29e   : > { %2367 = vst [vmem:[%s3320_s10 + $0x210] sm:$0xff] %v1657_v39  ;;  %v1659_v23 = vadd.f32 %v1658_v12, %v3327_v46 }
 0x29f   : > { %v1662_v7 = vpop.f32.mrf.mxu1 }
 0x2a0   : > { %2368 = vst [vmem:[%s3320_s10 + $0x218] sm:$0xff] %v1659_v23  ;;  %v1663_v61 = vadd.f32 %v1662_v7, %v3333_v2 }
 0x2a1   : > { %v1664_v53 = vpop.f32.mrf.mxu1 }
 0x2a2   : > { %2369 = vst [vmem:[%s3320_s10 + $0x220] sm:$0xff] %v1663_v61  ;;  %v1665_v32 = vadd.f32 %v1664_v53, %v3333_v2 }
 0x2a3   : > { %v1666_v11 = vpop.f32.mrf.mxu1 }
 0x2a4   : > { %2370 = vst [vmem:[%s3320_s10 + $0x228] sm:$0xff] %v1665_v32  ;;  %v1667_v59 = vadd.f32 %v1666_v11, %v3341_v31 }
 0x2a5   : > { %v1668_v41 = vpop.f32.mrf.mxu1 }
 0x2a6   : > { %2371 = vst [vmem:[%s3320_s10 + $0x230] sm:$0xff] %v1667_v59  ;;  %v1669_v33 = vadd.f32 %v1668_v41, %v3341_v31 }
 0x2a7   : > { %v1672_v45 = vpop.f32.mrf.mxu1 }
 0x2a8   : > { %2372 = vst [vmem:[%s3320_s10 + $0x238] sm:$0xff] %v1669_v33  ;;  %v1673_v60 = vadd.f32 %v1672_v45, %v3347_v22 }
 0x2a9   : > { %v1674_v28 = vpop.f32.mrf.mxu1 }
 0x2aa   : > { %2373 = vst [vmem:[%s3320_s10 + $0x240] sm:$0xff] %v1673_v60  ;;  %v1675_v24 = vadd.f32 %v1674_v28, %v3347_v22 }
 0x2ab   : > { %v1676_v47 = vpop.f32.mrf.mxu1 }
 0x2ac   : > { %2374 = vst [vmem:[%s3320_s10 + $0x248] sm:$0xff] %v1675_v24  ;;  %v1677_v42 = vadd.f32 %v1676_v47, %v3355_v38 }
 0x2ad   : > { %v1678_v1 = vpop.f32.mrf.mxu1 }
 0x2ae   : > { %2375 = vst [vmem:[%s3320_s10 + $0x250] sm:$0xff] %v1677_v42  ;;  %v1679_v27 = vadd.f32 %v1678_v1, %v3355_v38 }
 0x2af   : > { %v1682_v16 = vpop.f32.mrf.mxu1 }
 0x2b0   : > { %2376 = vst [vmem:[%s3320_s10 + $0x258] sm:$0xff] %v1679_v27  ;;  %v1683_v9 = vadd.f32 %v1682_v16, %v3361_v58 }
 0x2b1   : > { %v1684_v40 = vpop.f32.mrf.mxu1 }
 0x2b2   : > { %2377 = vst [vmem:[%s3320_s10 + $0x260] sm:$0xff] %v1683_v9  ;;  %v1685_v19 = vadd.f32 %v1684_v40, %v3361_v58 }
 0x2b3   : > { %v1686_v48 = vpop.f32.mrf.mxu1 }
 0x2b4   : > { %2378 = vst [vmem:[%s3320_s10 + $0x268] sm:$0xff] %v1685_v19  ;;  %v1687_v14 = vadd.f32 %v1686_v48, %v3369_v52 }
 0x2b5   : > { %v1688_v17 = vpop.f32.mrf.mxu1 }
 0x2b6   : > { %2379 = vst [vmem:[%s3320_s10 + $0x270] sm:$0xff] %v1687_v14  ;;  %v1689_v34 = vadd.f32 %v1688_v17, %v3369_v52 }
 0x2b7   : > { %v1692_v6 = vpop.f32.mrf.mxu1 }
 0x2b8   : > { %2380 = vst [vmem:[%s3320_s10 + $0x278] sm:$0xff] %v1689_v34  ;;  %v1693_v44 = vadd.f32 %v1692_v6, %v3375_v43 }
 0x2b9   : > { %v1694_v25 = vpop.f32.mrf.mxu1 }
 0x2ba   : > { %2381 = vst [vmem:[%s3320_s10 + $0x280] sm:$0xff] %v1693_v44  ;;  %v1695_v50 = vadd.f32 %v1694_v25, %v3375_v43 }
 0x2bb   : > { %v1696_v13 = vpop.f32.mrf.mxu1 }
 0x2bc   : > { %2382 = vst [vmem:[%s3320_s10 + $0x288] sm:$0xff] %v1695_v50  ;;  %v1697_v4 = vadd.f32 %v1696_v13, %v3383_v54 }
 0x2bd   : > { %v1698_v36 = vpop.f32.mrf.mxu1 }
 0x2be   : > { %2383 = vst [vmem:[%s3320_s10 + $0x290] sm:$0xff] %v1697_v4  ;;  %v1699_v8 = vadd.f32 %v1698_v36, %v3383_v54 }
 0x2bf   : > { %v1702_v49 = vpop.f32.mrf.mxu1 }
 0x2c0   : > { %2384 = vst [vmem:[%s3320_s10 + $0x298] sm:$0xff] %v1699_v8  ;;  %v1703_v26 = vadd.f32 %v1702_v49, %v3389_v18 }
 0x2c1   : > { %v1704_v0 = vpop.f32.mrf.mxu1 }
 0x2c2   : > { %2385 = vst [vmem:[%s3320_s10 + $0x2a0] sm:$0xff] %v1703_v26  ;;  %v1705_v35 = vadd.f32 %v1704_v0, %v3389_v18 }
 0x2c3   : > { %v1706_v10 = vpop.f32.mrf.mxu1 }
 0x2c4   : > { %2386 = vst [vmem:[%s3320_s10 + $0x2a8] sm:$0xff] %v1705_v35  ;;  %v1707_v62 = vadd.f32 %v1706_v10, %v3397_v55 }
 0x2c5   : > { %v1708_v20 = vpop.f32.mrf.mxu1 }
 0x2c6   : > { %2387 = vst [vmem:[%s3320_s10 + $0x2b0] sm:$0xff] %v1707_v62  ;;  %v1709_v15 = vadd.f32 %v1708_v20, %v3397_v55 }
 0x2c7   : > { %v1712_v3 = vpop.f32.mrf.mxu1 }
 0x2c8   : > { %2388 = vst [vmem:[%s3320_s10 + $0x2b8] sm:$0xff] %v1709_v15  ;;  %v1713_v51 = vadd.f32 %v1712_v3, %v3403_v57 }
 0x2c9   : > { %v1714_v5 = vpop.f32.mrf.mxu1 }
 0x2ca   : > { %2389 = vst [vmem:[%s3320_s10 + $0x2c0] sm:$0xff] %v1713_v51  ;;  %v1715_v63 = vadd.f32 %v1714_v5, %v3403_v57 }
 0x2cb   : > { %v1716_v21 = vpop.f32.mrf.mxu1 }
 0x2cc   : > { %2390 = vst [vmem:[%s3320_s10 + $0x2c8] sm:$0xff] %v1715_v63  ;;  %v1717_v39 = vadd.f32 %v1716_v21, %v3411_v30 }
 0x2cd   : > { %v1718_v12 = vpop.f32.mrf.mxu1 }
 0x2ce   : > { %2391 = vst [vmem:[%s3320_s10 + $0x2d0] sm:$0xff] %v1717_v39  ;;  %v1719_v23 = vadd.f32 %v1718_v12, %v3411_v30 }
 0x2cf   : > { %v1722_v7 = vpop.f32.mrf.mxu1 }
 0x2d0   : > { %2392 = vst [vmem:[%s3320_s10 + $0x2d8] sm:$0xff] %v1719_v23  ;;  %v1723_v61 = vadd.f32 %v1722_v7, %v3417_v37 }
 0x2d1   : > { %v1724_v53 = vpop.f32.mrf.mxu1 }
 0x2d2   : > { %2393 = vst [vmem:[%s3320_s10 + $0x2e0] sm:$0xff] %v1723_v61  ;;  %v1725_v32 = vadd.f32 %v1724_v53, %v3417_v37 }
 0x2d3   : > { %v1726_v11 = vpop.f32.mrf.mxu1 }
 0x2d4   : > { %2394 = vst [vmem:[%s3320_s10 + $0x2e8] sm:$0xff] %v1725_v32  ;;  %v1727_v59 = vadd.f32 %v1726_v11, %v3424_v29 }
 0x2d5   : > { %v1728_v41 = vpop.f32.mrf.mxu1 }
 0x2d6   : > { %2395 = vst [vmem:[%s3320_s10 + $0x2f0] sm:$0xff] %v1727_v59  ;;  %v1729_v33 = vadd.f32 %v1728_v41, %v3424_v29 }
 0x2d7   : > { %v2056_v45 = vpop.f32.mrf.mxu1 }
 0x2d8   : > { %2396 = vst [vmem:[%s3320_s10 + $0x2f8] sm:$0xff] %v1729_v33  ;;  %v2057_v60 = vadd.f32 %v2056_v45, %v3315_v56 }
 0x2d9   : > { %v2058_v28 = vpop.f32.mrf.mxu1 }
 0x2da   : > { %2429 = vst [vmem:[%s3320_s10 + $0x300] sm:$0xff] %v2057_v60  ;;  %v2059_v24 = vadd.f32 %v2058_v28, %v3315_v56 }
 0x2db   : > { %v2060_v47 = vpop.f32.mrf.mxu1 }
 0x2dc   : > { %2430 = vst [vmem:[%s3320_s10 + $0x308] sm:$0xff] %v2059_v24  ;;  %v2061_v42 = vadd.f32 %v2060_v47, %v3327_v46 }
 0x2dd   : > { %v2062_v1 = vpop.f32.mrf.mxu1 }
 0x2de   : > { %2431 = vst [vmem:[%s3320_s10 + $0x310] sm:$0xff] %v2061_v42  ;;  %v2063_v27 = vadd.f32 %v2062_v1, %v3327_v46 }
 0x2df   : > { %v2066_v16 = vpop.f32.mrf.mxu1 }
 0x2e0   : > { %2432 = vst [vmem:[%s3320_s10 + $0x318] sm:$0xff] %v2063_v27  ;;  %v2067_v9 = vadd.f32 %v2066_v16, %v3333_v2 }
 0x2e1   : > { %v2068_v40 = vpop.f32.mrf.mxu1 }
 0x2e2   : > { %2433 = vst [vmem:[%s3320_s10 + $0x320] sm:$0xff] %v2067_v9  ;;  %v2069_v56 = vadd.f32 %v2068_v40, %v3333_v2 }
 0x2e3   : > { %v2070_v19 = vpop.f32.mrf.mxu1 }
 0x2e4   : > { %2434 = vst [vmem:[%s3320_s10 + $0x328] sm:$0xff] %v2069_v56  ;;  %v2071_v48 = vadd.f32 %v2070_v19, %v3341_v31 }
 0x2e5   : > { %v2072_v14 = vpop.f32.mrf.mxu1 }
 0x2e6   : > { %2435 = vst [vmem:[%s3320_s10 + $0x330] sm:$0xff] %v2071_v48  ;;  %v2073_v46 = vadd.f32 %v2072_v14, %v3341_v31 }
 0x2e7   : > { %v2076_v17 = vpop.f32.mrf.mxu1 }
 0x2e8   : > { %2436 = vst [vmem:[%s3320_s10 + $0x338] sm:$0xff] %v2073_v46  ;;  %v2077_v34 = vadd.f32 %v2076_v17, %v3347_v22 }
 0x2e9   : > { %v2078_v6 = vpop.f32.mrf.mxu1 }
 0x2ea   : > { %2437 = vst [vmem:[%s3320_s10 + $0x340] sm:$0xff] %v2077_v34  ;;  %v2079_v2 = vadd.f32 %v2078_v6, %v3347_v22 }
 0x2eb   : > { %v2080_v44 = vpop.f32.mrf.mxu1 }
 0x2ec   : > { %2438 = vst [vmem:[%s3320_s10 + $0x348] sm:$0xff] %v2079_v2  ;;  %v2081_v25 = vadd.f32 %v2080_v44, %v3355_v38 }
 0x2ed   : > { %v2082_v50 = vpop.f32.mrf.mxu1 }
 0x2ee   : > { %2439 = vst [vmem:[%s3320_s10 + $0x350] sm:$0xff] %v2081_v25  ;;  %v2083_v31 = vadd.f32 %v2082_v50, %v3355_v38 }
 0x2ef   : > { %v2086_v13 = vpop.f32.mrf.mxu1 }
 0x2f0   : > { %2440 = vst [vmem:[%s3320_s10 + $0x358] sm:$0xff] %v2083_v31  ;;  %v2087_v4 = vadd.f32 %v2086_v13, %v3361_v58 }
 0x2f1   : > { %v2088_v36 = vpop.f32.mrf.mxu1 }
 0x2f2   : > { %2441 = vst [vmem:[%s3320_s10 + $0x360] sm:$0xff] %v2087_v4  ;;  %v2089_v22 = vadd.f32 %v2088_v36, %v3361_v58 }
 0x2f3   : > { %v2090_v8 = vpop.f32.mrf.mxu1 }
 0x2f4   : > { %2442 = vst [vmem:[%s3320_s10 + $0x368] sm:$0xff] %v2089_v22  ;;  %v2091_v49 = vadd.f32 %v2090_v8, %v3369_v52 }
 0x2f5   : > { %v2092_v26 = vpop.f32.mrf.mxu1 }
 0x2f6   : > { %2443 = vst [vmem:[%s3320_s10 + $0x370] sm:$0xff] %v2091_v49  ;;  %v2093_v38 = vadd.f32 %v2092_v26, %v3369_v52 }
 0x2f7   : > { %v2096_v0 = vpop.f32.mrf.mxu1 }
 0x2f8   : > { %2444 = vst [vmem:[%s3320_s10 + $0x378] sm:$0xff] %v2093_v38  ;;  %v2097_v35 = vadd.f32 %v2096_v0, %v3375_v43 }
 0x2f9   : > { %v2098_v10 = vpop.f32.mrf.mxu1 }
 0x2fa   : > { %2445 = vst [vmem:[%s3320_s10 + $0x380] sm:$0xff] %v2097_v35  ;;  %v2099_v58 = vadd.f32 %v2098_v10, %v3375_v43 }
 0x2fb   : > { %v2100_v62 = vpop.f32.mrf.mxu1 }
 0x2fc   : > { %2446 = vst [vmem:[%s3320_s10 + $0x388] sm:$0xff] %v2099_v58  ;;  %v2101_v20 = vadd.f32 %v2100_v62, %v3383_v54 }
 0x2fd   : > { %v2102_v15 = vpop.f32.mrf.mxu1 }
 0x2fe   : > { %2447 = vst [vmem:[%s3320_s10 + $0x390] sm:$0xff] %v2101_v20  ;;  %v2103_v52 = vadd.f32 %v2102_v15, %v3383_v54 }
 0x2ff   : > { %v2106_v3 = vpop.f32.mrf.mxu1 }
 0x300   : > { %2448 = vst [vmem:[%s3320_s10 + $0x398] sm:$0xff] %v2103_v52  ;;  %v2107_v51 = vadd.f32 %v2106_v3, %v3389_v18 }
 0x301   : > { %v2108_v5 = vpop.f32.mrf.mxu1 }
 0x302   : > { %2449 = vst [vmem:[%s3320_s10 + $0x3a0] sm:$0xff] %v2107_v51  ;;  %v2109_v43 = vadd.f32 %v2108_v5, %v3389_v18 }
 0x303   : > { %v2110_v63 = vpop.f32.mrf.mxu1 }
 0x304   : > { %2450 = vst [vmem:[%s3320_s10 + $0x3a8] sm:$0xff] %v2109_v43  ;;  %v2111_v21 = vadd.f32 %v2110_v63, %v3397_v55 }
 0x305   : > { %v2112_v39 = vpop.f32.mrf.mxu1 }
 0x306   : > { %2451 = vst [vmem:[%s3320_s10 + $0x3b0] sm:$0xff] %v2111_v21  ;;  %v2113_v54 = vadd.f32 %v2112_v39, %v3397_v55 }
 0x307   : > { %v2116_v12 = vpop.f32.mrf.mxu1 }
 0x308   : > { %2452 = vst [vmem:[%s3320_s10 + $0x3b8] sm:$0xff] %v2113_v54  ;;  %v2117_v23 = vadd.f32 %v2116_v12, %v3403_v57 }
 0x309   : > { %v2118_v7 = vpop.f32.mrf.mxu1 }
 0x30a   : > { %2453 = vst [vmem:[%s3320_s10 + $0x3c0] sm:$0xff] %v2117_v23  ;;  %v2119_v18 = vadd.f32 %v2118_v7, %v3403_v57 }
 0x30b   : > { %v2120_v61 = vpop.f32.mrf.mxu1 }
 0x30c   : > { %2454 = vst [vmem:[%s3320_s10 + $0x3c8] sm:$0xff] %v2119_v18  ;;  %v2121_v53 = vadd.f32 %v2120_v61, %v3411_v30 }
 0x30d   : > { %v2122_v32 = vpop.f32.mrf.mxu1 }
 0x30e   : > { %2455 = vst [vmem:[%s3320_s10 + $0x3d0] sm:$0xff] %v2121_v53  ;;  %v2123_v55 = vadd.f32 %v2122_v32, %v3411_v30 }
 0x30f   : > { %v2126_v11 = vpop.f32.mrf.mxu1 }
 0x310   : > { %2456 = vst [vmem:[%s3320_s10 + $0x3d8] sm:$0xff] %v2123_v55  ;;  %v2127_v59 = vadd.f32 %v2126_v11, %v3417_v37 }
 0x311   : > { %v2128_v41 = vpop.f32.mrf.mxu1 }
 0x312   : > { %2457 = vst [vmem:[%s3320_s10 + $0x3e0] sm:$0xff] %v2127_v59  ;;  %v2129_v33 = vadd.f32 %v2128_v41, %v3417_v37 }
 0x313   : > { %v2130_v45 = vpop.f32.mrf.mxu1 }
 0x314   : > { %2458 = vst [vmem:[%s3320_s10 + $0x3e8] sm:$0xff] %v2129_v33  ;;  %v2131_v57 = vadd.f32 %v2130_v45, %v3424_v29 }
 0x315   : > { %v2132_v60 = vpop.f32.mrf.mxu1 }
 0x316   : > { %2459 = vst [vmem:[%s3320_s10 + $0x3f0] sm:$0xff] %v2131_v57  ;;  %v2133_v28 = vadd.f32 %v2132_v60, %v3424_v29 }
 0x318   : > { %2460 = vst [vmem:[%s3320_s10 + $0x3f8] sm:$0xff] %v2133_v28 }
 0x319 PF: > { %s15_s18 = sadd.s32 1, %s2594_s18  }
 0x31a   : > { %p12_p4 = scmp.ge.s32.totalorder %s15_s18, 6  }
 0x31c   :  { %14 = sbr.rel (!%p12_p4) target bundleno = 1 (0x1), region = 76 }

</bundles_post_ra>
